<compile_context>
chip_gen: v6e
topology: v6e:2x2x1
jax: 0.10.0
libtpu: 0.0.40
codegen_flags: <defaults>
</compile_context>

<pallas_src>
import functools

import jax
import jax.numpy as jnp
from jax import lax
from jax.experimental import pallas as pl
from jax.experimental.pallas import tpu as pltpu

HIDDEN = 768            # BERT hidden size (fixed by nn.Linear(768, classes_num))
LANE = 128              # TPU lane width; classifier output cols padded to this.
MAX_SINGLE_TILE_MIX = 512   # above this, mixup uses the dual-stream tiled path


# ----------------------------------------------------------------------------
# Small helpers
# ----------------------------------------------------------------------------
def _pad_to_lane(c):
    return ((c + LANE - 1) // LANE) * LANE


def _round_up(x, m):
    return ((x + m - 1) // m) * m


def _i32(v):
    v &= 0xFFFFFFFF
    return jnp.int32(v - (1 << 32) if v >= (1 << 31) else v)


def _device_info():
    try:
        d = jax.devices()[0]
        return d.platform, d.device_kind.lower()
    except Exception:  # pragma: no cover
        return "cpu", ""


_PLATFORM, _KIND = _device_info()
# bf16 elementwise (tanh/mix/dropout) only where the VPU/EUP have bf16 paths.
_EW_DTYPE = (jnp.bfloat16
             if (_PLATFORM == "tpu" and ("v6" in _KIND or "v7" in _KIND or "7x" in _KIND))
             else jnp.float32)
_IS_V7 = _PLATFORM == "tpu" and ("v7" in _KIND or "7x" in _KIND)

_SMEM_SPEC = pl.BlockSpec(memory_space=pltpu.MemorySpace.SMEM)


def _const_spec(shape):
    # Weights never change across the grid.  On v7x, single-buffer them to
    # save scoped VMEM (irrelevant on v5e/v6e's 128 MiB).
    if _IS_V7 and hasattr(pl, "Buffered"):
        return pl.BlockSpec(shape, lambda i: (0, 0), pipeline_mode=pl.Buffered(1))
    return pl.BlockSpec(shape, lambda i: (0, 0))


def _weight_specs(c_pad):
    return [_const_spec((HIDDEN, HIDDEN)),   # W_pool (bf16, VMEM-resident)
            _const_spec((1, HIDDEN)),        # b_pool (f32)
            _const_spec((HIDDEN, c_pad)),    # W_cls padded (bf16)
            _const_spec((1, c_pad))]         # b_cls padded (f32)


def _choose_tile(n_pad, max_tile=512):
    """Largest divisor of n_pad that is a multiple of 16 and <= max_tile,
    preferring >=2 grid steps (v7x megacore) when the batch allows it."""
    cands = [d for d in range(16, min(n_pad, max_tile) + 1, 16) if n_pad % d == 0]
    if not cands:
        return n_pad
    tm = max(cands)
    if tm == n_pad and n_pad >= 32:
        smaller = [d for d in cands if 2 * d <= n_pad]
        if smaller:
            tm = max(smaller)
    return tm


# ----------------------------------------------------------------------------
# In-kernel building blocks
# ----------------------------------------------------------------------------
def _pool(cls_bf16, wp, bp, ew_dtype):
    # BERT pooler: bf16 MXU operands, f32 accumulation, elementwise in ew_dtype.
    acc = jnp.dot(cls_bf16, wp, preferred_element_type=jnp.float32) + bp
    return jnp.tanh(acc.astype(ew_dtype))


def _classify(x, wc, bc, out_ref):
    logits = jnp.dot(x.astype(jnp.bfloat16), wc,
                     preferred_element_type=jnp.float32) + bc
    out_ref[...] = jax.nn.sigmoid(logits).astype(out_ref.dtype)


def _uniform01(shape, row0, seed):
    # Counter-based hash PRNG (murmur-style finalizer) built from plain
    # jnp/lax ops: portable (TPU + interpret mode) and, because it is keyed on
    # the *global* (row, col) position plus the seed, the realized dropout
    # mask is independent of the batch tiling.
    row = lax.broadcasted_iota(jnp.int32, shape, 0) + row0
    col = lax.broadcasted_iota(jnp.int32, shape, 1)
    x = row * jnp.int32(HIDDEN) + col + seed * _i32(0x9E3779B9)

    def _srl(v, k):
        return lax.shift_right_logical(v, jnp.full(shape, k, jnp.int32))

    x = (x ^ _srl(x, 16)) * _i32(0x7FEB352D)
    x = (x ^ _srl(x, 15)) * _i32(0x846CA68B)
    x = x ^ _srl(x, 16)
    x = x & jnp.int32(0x7FFFFF)                       # 23 random bits, >= 0
    return x.astype(jnp.float32) * jnp.float32(1.0 / (1 << 23))


# ----------------------------------------------------------------------------
# Kernels (pooler -> [mixup -> dropout] -> linear -> sigmoid, all in VMEM)
# ----------------------------------------------------------------------------
def head_eval_kernel(cls_ref, wp_ref, bp_ref, wc_ref, bc_ref, out_ref, *,
                     ew_dtype):
    pooled = _pool(cls_ref[...], wp_ref[...], bp_ref[...], ew_dtype)
    # Eval mode: mixup and dropout are identities -> elided entirely.
    _classify(pooled, wc_ref[...], bc_ref[...], out_ref)


def head_drop_kernel(seed_ref, cls_ref, wp_ref, bp_ref, wc_ref, bc_ref,
                     out_ref, *, dropout_p, tm, ew_dtype):
    # Training, mixup inactive: single stream, one pooler matmul, dropout only.
    pooled = _pool(cls_ref[...], wp_ref[...], bp_ref[...], ew_dtype)
    if dropout_p > 0.0:
        row0 = pl.program_id(0) * tm
        u = _uniform01(pooled.shape, row0, seed_ref[0])
        scale = jnp.where(u >= jnp.float32(dropout_p),
                          jnp.float32(1.0 / (1.0 - dropout_p)),
                          jnp.float32(0.0)).astype(ew_dtype)
        pooled = pooled * scale
    _classify(pooled, wc_ref[...], bc_ref[...], out_ref)


def head_mix_single_kernel(scal_ref, seed_ref, idx_ref, cls_ref, wp_ref,
                           bp_ref, wc_ref, bc_ref, out_ref, *,
                           dropout_p, ew_dtype):
    # Training, mixup active, whole (padded) batch in ONE tile: pool once and
    # gather the shuffled rows in VMEM with a permutation matmul on the MXU.
    pooled = _pool(cls_ref[...], wp_ref[...], bp_ref[...], ew_dtype)
    tm = pooled.shape[0]
    eq = idx_ref[...] == lax.broadcasted_iota(jnp.int32, (tm, tm), 1)
    perm = jnp.where(eq, 1.0, 0.0).astype(jnp.bfloat16)        # P[i,j]=1 iff idx[i]==j
    pooled_s = jnp.dot(perm, pooled.astype(jnp.bfloat16),
                       preferred_element_type=jnp.float32).astype(ew_dtype)

    # Manifold mixup at layer 12; 1/(1-p) already folded into the scalars.
    lam_a = scal_ref[0].astype(ew_dtype)
    lam_b = scal_ref[1].astype(ew_dtype)
    mixed = lam_a * pooled + lam_b * pooled_s

    if dropout_p > 0.0:
        u = _uniform01(mixed.shape, 0, seed_ref[0])
        mixed = jnp.where(u >= jnp.float32(dropout_p), mixed,
                          jnp.zeros_like(mixed))
    _classify(mixed, wc_ref[...], bc_ref[...], out_ref)


def head_mix_multi_kernel(scal_ref, seed_ref, cls_ref, cls_shuf_ref, wp_ref,
                          bp_ref, wc_ref, bc_ref, out_ref, *,
                          dropout_p, tm, ew_dtype):
    # Training, mixup active, batch tiled over the grid: shuffled rows may live
    # in another tile, so pool both streams (pooler is row-wise, so
    # tanh(cls[shuf] @ Wp + bp) == pooled[shuf] exactly).
    wp = wp_ref[...]
    bp = bp_ref[...]
    pooled = _pool(cls_ref[...], wp, bp, ew_dtype)
    pooled_s = _pool(cls_shuf_ref[...], wp, bp, ew_dtype)

    lam_a = scal_ref[0].astype(ew_dtype)
    lam_b = scal_ref[1].astype(ew_dtype)
    mixed = lam_a * pooled + lam_b * pooled_s

    if dropout_p > 0.0:
        row0 = pl.program_id(0) * tm
        u = _uniform01(mixed.shape, row0, seed_ref[0])
        mixed = jnp.where(u >= jnp.float32(dropout_p), mixed,
                          jnp.zeros_like(mixed))
    _classify(mixed, wc_ref[...], bc_ref[...], out_ref)


# ----------------------------------------------------------------------------
# pallas_call wrappers
# ----------------------------------------------------------------------------
def run_head_eval(cls_bf16, params):
    n_pad = cls_bf16.shape[0]
    c_pad = params["w_cls_pad"].shape[1]
    tm = _choose_tile(n_pad)
    return pl.pallas_call(
        functools.partial(head_eval_kernel, ew_dtype=_EW_DTYPE),
        out_shape=jax.ShapeDtypeStruct((n_pad, c_pad), jnp.float32),
        grid=(n_pad // tm,),
        in_specs=[pl.BlockSpec((tm, HIDDEN), lambda i: (i, 0))]
                 + _weight_specs(c_pad),
        out_specs=pl.BlockSpec((tm, c_pad), lambda i: (i, 0)),
        compiler_params=pltpu.CompilerParams(
            dimension_semantics=("parallel",)),
    )(cls_bf16, params["w_pool"], params["b_pool"],
      params["w_cls_pad"], params["b_cls_pad"])


def run_head_drop(cls_bf16, params, seed_arr, dropout_p):
    n_pad = cls_bf16.shape[0]
    c_pad = params["w_cls_pad"].shape[1]
    tm = _choose_tile(n_pad)
    kernel = functools.partial(head_drop_kernel, dropout_p=float(dropout_p),
                               tm=tm, ew_dtype=_EW_DTYPE)
    return pl.pallas_call(
        kernel,
        out_shape=jax.ShapeDtypeStruct((n_pad, c_pad), jnp.float32),
        grid=(n_pad // tm,),
        in_specs=[_SMEM_SPEC,
                  pl.BlockSpec((tm, HIDDEN), lambda i: (i, 0))]
                 + _weight_specs(c_pad),
        out_specs=pl.BlockSpec((tm, c_pad), lambda i: (i, 0)),
        compiler_params=pltpu.CompilerParams(
            dimension_semantics=("parallel",)),
    )(seed_arr, cls_bf16, params["w_pool"], params["b_pool"],
      params["w_cls_pad"], params["b_cls_pad"])


def run_head_mix_single(cls_bf16, idx_col, params, scal, seed_arr, dropout_p):
    n_pad = cls_bf16.shape[0]
    c_pad = params["w_cls_pad"].shape[1]
    kernel = functools.partial(head_mix_single_kernel,
                               dropout_p=float(dropout_p), ew_dtype=_EW_DTYPE)
    return pl.pallas_call(
        kernel,
        out_shape=jax.ShapeDtypeStruct((n_pad, c_pad), jnp.float32),
        grid=(1,),
        in_specs=[_SMEM_SPEC,                                   # [lam*inv, (1-lam)*inv]
                  _SMEM_SPEC,                                   # dropout seed
                  pl.BlockSpec((n_pad, 1), lambda i: (0, 0)),   # shuffled indices
                  pl.BlockSpec((n_pad, HIDDEN), lambda i: (0, 0))]
                 + _weight_specs(c_pad),
        out_specs=pl.BlockSpec((n_pad, c_pad), lambda i: (0, 0)),
        compiler_params=pltpu.CompilerParams(
            dimension_semantics=("arbitrary",)),
    )(scal, seed_arr, idx_col, cls_bf16, params["w_pool"], params["b_pool"],
      params["w_cls_pad"], params["b_cls_pad"])


def run_head_mix_multi(cls_bf16, cls_shuf_bf16, params, scal, seed_arr,
                       dropout_p):
    n_pad = cls_bf16.shape[0]
    c_pad = params["w_cls_pad"].shape[1]
    tm = _choose_tile(n_pad)
    kernel = functools.partial(head_mix_multi_kernel,
                               dropout_p=float(dropout_p), tm=tm,
                               ew_dtype=_EW_DTYPE)
    return pl.pallas_call(
        kernel,
        out_shape=jax.ShapeDtypeStruct((n_pad, c_pad), jnp.float32),
        grid=(n_pad // tm,),
        in_specs=[_SMEM_SPEC, _SMEM_SPEC,
                  pl.BlockSpec((tm, HIDDEN), lambda i: (i, 0)),
                  pl.BlockSpec((tm, HIDDEN), lambda i: (i, 0))]
                 + _weight_specs(c_pad),
        out_specs=pl.BlockSpec((tm, c_pad), lambda i: (i, 0)),
        compiler_params=pltpu.CompilerParams(
            dimension_semantics=("parallel",)),
    )(scal, seed_arr, cls_bf16, cls_shuf_bf16, params["w_pool"],
      params["b_pool"], params["w_cls_pad"], params["b_cls_pad"])


# ----------------------------------------------------------------------------
# Forward (mirrors Classifier.forward)
# ----------------------------------------------------------------------------
def classifier_forward(token_ids, mask, params, mixup_dict=None,
                       training=False, dropout_p=0.1, dropout_seed=0):
    del mask  # TODO(synk): attention mask feeds the (omitted) BERT encoder stack.
    classes = params["classes"]
    n = token_ids.shape[0]

    # Glue: embedding gather of the [CLS] (first) token; stream as bf16 so the
    # kernel's dominant HBM read is half-width (it feeds the MXU as bf16).
    cls_emb = params["embedding"][token_ids[:, 0]].astype(jnp.bfloat16)  # (N,768)

    mix_active = bool(training) and (mixup_dict is not None) \
        and mixup_dict.get("layer_num") == 12
    lam_raw = mixup_dict.get("lam") if mixup_dict is not None else None
    if mix_active and isinstance(lam_raw, (int, float)) and float(lam_raw) == 1.0:
        mix_active = False    # identity mix -> skip the extra work entirely

    n_pad = _round_up(n, 16)
    pad = n_pad - n

    def _padded(x):
        return jnp.pad(x, ((0, pad), (0, 0))) if pad else x

    if not training:
        out = run_head_eval(_padded(cls_emb), params)
    elif mix_active:
        lam = jnp.asarray(mixup_dict["lam"], jnp.float32)
        inv = jnp.float32(1.0 / (1.0 - dropout_p)) if dropout_p > 0.0 \
            else jnp.float32(1.0)
        scal = jnp.stack([lam, 1.0 - lam]).astype(jnp.float32) * inv
        seed_arr = jnp.asarray([dropout_seed], jnp.int32)
        idx = jnp.asarray(mixup_dict["shuffled_indices"], jnp.int32)
        if n_pad <= MAX_SINGLE_TILE_MIX:
            # Single fused tile: pool once, permute pooled rows on the MXU.
            if pad:
                idx = jnp.concatenate(
                    [idx, jnp.arange(n, n_pad, dtype=jnp.int32)])
            out = run_head_mix_single(_padded(cls_emb), idx.reshape(n_pad, 1),
                                      params, scal, seed_arr, dropout_p)
        else:
            # Batch tiled over the grid: dual-stream fallback.
            cls_shuf = cls_emb[idx]
            out = run_head_mix_multi(_padded(cls_emb), _padded(cls_shuf),
                                     params, scal, seed_arr, dropout_p)
    else:
        cls_p = _padded(cls_emb)
        if dropout_p > 0.0:
            seed_arr = jnp.asarray([dropout_seed], jnp.int32)
            out = run_head_drop(cls_p, params, seed_arr, dropout_p)
        else:
            out = run_head_eval(cls_p, params)

    return out[:n, :classes]


# ----------------------------------------------------------------------------
# Parameters + pure-JAX reference (for correctness checks)
# ----------------------------------------------------------------------------
def make_params(key, vocab, classes):
    k_emb, k_wp, k_w = jax.random.split(key, 3)
    c_pad = _pad_to_lane(classes)
    w_cls = jax.random.normal(k_w, (HIDDEN, classes), jnp.float32) * 0.02
    w_cls_pad = jnp.zeros((HIDDEN, c_pad), jnp.bfloat16).at[:, :classes].set(
        w_cls.astype(jnp.bfloat16))
    return {
        "embedding": jax.random.normal(k_emb, (vocab, HIDDEN), jnp.float32) * 0.02,
        "w_pool": (jax.random.normal(k_wp, (HIDDEN, HIDDEN), jnp.float32)
                   * 0.02).astype(jnp.bfloat16),
        "b_pool": jnp.zeros((1, HIDDEN), jnp.float32),
        "w_cls_pad": w_cls_pad,
        "b_cls_pad": jnp.zeros((1, c_pad), jnp.float32),
        "classes": classes,
    }


def _ref_forward(cls_bf16, params, idx=None, lam=1.0):
    pooled = jnp.tanh(jnp.dot(cls_bf16, params["w_pool"],
                              preferred_element_type=jnp.float32)
                      + params["b_pool"])
    if idx is not None:
        pooled = lam * pooled + (1.0 - lam) * pooled[jnp.asarray(idx)]
    logits = jnp.dot(pooled.astype(jnp.bfloat16), params["w_cls_pad"],
                     preferred_element_type=jnp.float32) + params["b_cls_pad"]
    return jax.nn.sigmoid(logits)[:, :params["classes"]]


# ----------------------------------------------------------------------------
# Main
# ----------------------------------------------------------------------------
if __name__ == "__main__":
    N, S, VOCAB, CLASSES = 8, 8, 32, 8

    key = jax.random.PRNGKey(0)
    k_tok, k_params, k_tok2, k_tok3 = jax.random.split(key, 4)

    token_ids = jax.random.randint(k_tok, (N, S), 0, VOCAB, dtype=jnp.int32)
    attn_mask = jnp.ones((N, S), jnp.int32)
    params = make_params(k_params, VOCAB, CLASSES)

    mixup_dict = {"layer_num": 12,
                  "shuffled_indices": jnp.arange(N)[::-1],
                  "lam": 0.7}

    # 1) Training: mixup + in-kernel dropout (single fused tile, MXU permute).
    logits_train = classifier_forward(token_ids, attn_mask, params,
                                      mixup_dict=mixup_dict, training=True,
                                      dropout_p=0.1, dropout_seed=1234)
    # 2) Training: mixup with dropout disabled (exact mixup numerics check).
    logits_mix = classifier_forward(token_ids, attn_mask, params,
                                    mixup_dict=mixup_dict, training=True,
                                    dropout_p=0.0, dropout_seed=0)
    # 3) Eval mode (mixup / dropout identities elided).
    logits_eval = classifier_forward(token_ids, attn_mask, params,
                                     mixup_dict=mixup_dict, training=False)
    # 4) Training without mixup: dropout-only kernel over a tiled batch.
    N2 = 32
    token_ids2 = jax.random.randint(k_tok2, (N2, S), 0, VOCAB, dtype=jnp.int32)
    logits_drop = classifier_forward(token_ids2, jnp.ones((N2, S), jnp.int32),
                                     params, mixup_dict=None, training=True,
                                     dropout_p=0.1, dropout_seed=7)
    # 5) Larger batch: dual-stream mixup kernel across a tiled grid.
    N3 = 1536
    token_ids3 = jax.random.randint(k_tok3, (N3, S), 0, VOCAB, dtype=jnp.int32)
    mixup3 = {"layer_num": 12,
              "shuffled_indices": jax.random.permutation(jax.random.PRNGKey(3), N3),
              "lam": 0.4}
    logits_big = classifier_forward(token_ids3, jnp.ones((N3, S), jnp.int32),
                                    params, mixup_dict=mixup3, training=True,
                                    dropout_p=0.0, dropout_seed=0)

    for x in (logits_train, logits_mix, logits_eval, logits_drop, logits_big):
        jax.block_until_ready(x)

    # Shape / range checks.
    assert logits_train.shape == (N, CLASSES)
    assert logits_mix.shape == (N, CLASSES)
    assert logits_eval.shape == (N, CLASSES)
    assert logits_drop.shape == (N2, CLASSES)
    assert logits_big.shape == (N3, CLASSES)
    for x in (logits_train, logits_mix, logits_eval, logits_drop, logits_big):
        assert bool(jnp.all((x >= 0.0) & (x <= 1.0)))

    # Numerical checks against a pure-JAX reference (bf16 matmul / f32 accum).
    cls1 = params["embedding"][token_ids[:, 0]].astype(jnp.bfloat16)
    ref_eval = _ref_forward(cls1, params)
    ref_mix = _ref_forward(cls1, params,
                           idx=mixup_dict["shuffled_indices"], lam=0.7)
    cls3 = params["embedding"][token_ids3[:, 0]].astype(jnp.bfloat16)
    ref_big = _ref_forward(cls3, params,
                           idx=mixup3["shuffled_indices"], lam=0.4)

    assert float(jnp.max(jnp.abs(logits_eval - ref_eval))) < 2e-2
    assert float(jnp.max(jnp.abs(logits_mix - ref_mix))) < 2e-2
    assert float(jnp.max(jnp.abs(logits_big - ref_big))) < 2e-2

    print("KERNEL_OK")
</pallas_src>

<mosaic_0001>
module attributes {stable_mosaic.version = 11 : i64} {
  func.func @head_mix_single_kernel(%arg0: i32, %arg1: memref<2xf32, #tpu.memory_space<smem>>, %arg2: memref<1xi32, #tpu.memory_space<smem>>, %arg3: memref<16x1xi32, #tpu.memory_space<vmem>>, %arg4: memref<16x768xbf16, #tpu.memory_space<vmem>>, %arg5: memref<768x768xbf16, #tpu.memory_space<vmem>>, %arg6: memref<1x768xf32, #tpu.memory_space<vmem>>, %arg7: memref<768x128xbf16, #tpu.memory_space<vmem>>, %arg8: memref<1x128xf32, #tpu.memory_space<vmem>>, %arg9: memref<16x128xf32, #tpu.memory_space<vmem>>) attributes {dimension_semantics = [#tpu.dimension_semantics<arbitrary>], iteration_bounds = array<i64: 1>, scalar_prefetch = 0 : i64, scratch_operands = 0 : i64, tpu.core_type = #tpu.core_type<tc>, window_params = [{transform_indices = @transform_0, window_bounds = array<i64: 2>}, {transform_indices = @transform_1, window_bounds = array<i64: 1>}, {pipeline_mode = #tpu.pipeline_mode<synchronous>, transform_indices = @transform_2, window_bounds = array<i64: 16, 1>}, {pipeline_mode = #tpu.pipeline_mode<synchronous>, transform_indices = @transform_3, window_bounds = array<i64: 16, 768>}, {pipeline_mode = #tpu.pipeline_mode<synchronous>, transform_indices = @transform_4, window_bounds = array<i64: 768, 768>}, {pipeline_mode = #tpu.pipeline_mode<synchronous>, transform_indices = @transform_5, window_bounds = array<i64: 1, 768>}, {pipeline_mode = #tpu.pipeline_mode<synchronous>, transform_indices = @transform_6, window_bounds = array<i64: 768, 128>}, {pipeline_mode = #tpu.pipeline_mode<synchronous>, transform_indices = @transform_7, window_bounds = array<i64: 1, 128>}, {pipeline_mode = #tpu.pipeline_mode<synchronous>, transform_indices = @transform_8, window_bounds = array<i64: 16, 128>}]} {
    %c0 = arith.constant 0 : index
    %c0_0 = arith.constant 0 : index
    %0 = vector.load %arg4[%c0, %c0_0] : memref<16x768xbf16, #tpu.memory_space<vmem>>, vector<16x768xbf16>
    %c0_1 = arith.constant 0 : index
    %c0_2 = arith.constant 0 : index
    %1 = vector.load %arg5[%c0_1, %c0_2] : memref<768x768xbf16, #tpu.memory_space<vmem>>, vector<768x768xbf16>
    %c0_3 = arith.constant 0 : index
    %c0_4 = arith.constant 0 : index
    %2 = vector.load %arg6[%c0_3, %c0_4] : memref<1x768xf32, #tpu.memory_space<vmem>>, vector<1x768xf32>
    %cst = arith.constant dense<0.000000e+00> : vector<16x768xf32>
    %3 = tpu.matmul %0, %1, %cst {dimension_numbers = #tpu.dot_dimension_numbers<[1], [0], [0], [1], [0, 0, 1, 1], [], []>} : vector<16x768xbf16>, vector<768x768xbf16>, vector<16x768xf32> -> vector<16x768xf32>
    %4 = vector.broadcast %2 : vector<1x768xf32> to vector<16x768xf32>
    %5 = arith.addf %3, %4 : vector<16x768xf32>
    %6 = math.tanh %5 : vector<16x768xf32>
    %c0_5 = arith.constant 0 : index
    %c0_6 = arith.constant 0 : index
    %7 = vector.load %arg3[%c0_5, %c0_6] : memref<16x1xi32, #tpu.memory_space<vmem>>, vector<16x1xi32>
    %8 = tpu.iota {dimensions = array<i32: 1>} : vector<16x16xi32>
    %9 = vector.broadcast %7 : vector<16x1xi32> to vector<16x16xi32>
    %10 = arith.cmpi eq, %9, %8 : vector<16x16xi32>
    %cst_7 = arith.constant 1.000000e+00 : f32
    %cst_8 = arith.constant 0.000000e+00 : f32
    %11 = vector.broadcast %cst_7 : f32 to vector<16x16xf32>
    %12 = vector.broadcast %cst_8 : f32 to vector<16x16xf32>
    %13 = arith.select %10, %11, %12 : vector<16x16xi1>, vector<16x16xf32>
    %14 = arith.truncf %13 : vector<16x16xf32> to vector<16x16xbf16>
    %15 = arith.truncf %6 : vector<16x768xf32> to vector<16x768xbf16>
    %cst_9 = arith.constant dense<0.000000e+00> : vector<16x768xf32>
    %16 = tpu.matmul %14, %15, %cst_9 {dimension_numbers = #tpu.dot_dimension_numbers<[1], [0], [0], [1], [0, 0, 1, 1], [], []>} : vector<16x16xbf16>, vector<16x768xbf16>, vector<16x768xf32> -> vector<16x768xf32>
    %c0_10 = arith.constant 0 : index
    %17 = memref.load %arg1[%c0_10] : memref<2xf32, #tpu.memory_space<smem>>
    %c1 = arith.constant 1 : index
    %18 = memref.load %arg1[%c1] : memref<2xf32, #tpu.memory_space<smem>>
    %19 = vector.broadcast %17 : f32 to vector<16x768xf32>
    %20 = arith.mulf %19, %6 : vector<16x768xf32>
    %21 = vector.broadcast %18 : f32 to vector<16x768xf32>
    %22 = arith.mulf %21, %16 : vector<16x768xf32>
    %23 = arith.addf %20, %22 : vector<16x768xf32>
    %c0_11 = arith.constant 0 : index
    %24 = memref.load %arg2[%c0_11] : memref<1xi32, #tpu.memory_space<smem>>
    %25 = tpu.iota {dimensions = array<i32: 0>} : vector<16x768xi32>
    %c0_i32 = arith.constant 0 : i32
    %26 = vector.broadcast %c0_i32 : i32 to vector<16x768xi32>
    %27 = arith.addi %25, %26 : vector<16x768xi32>
    %28 = tpu.iota {dimensions = array<i32: 1>} : vector<16x768xi32>
    %c768_i32 = arith.constant 768 : i32
    %29 = vector.broadcast %c768_i32 : i32 to vector<16x768xi32>
    %30 = arith.muli %27, %29 : vector<16x768xi32>
    %31 = arith.addi %30, %28 : vector<16x768xi32>
    %c-1640531527_i32 = arith.constant -1640531527 : i32
    %32 = arith.muli %24, %c-1640531527_i32 : i32
    %33 = vector.broadcast %32 : i32 to vector<16x768xi32>
    %34 = arith.addi %31, %33 : vector<16x768xi32>
    %c16_i32 = arith.constant 16 : i32
    %35 = vector.broadcast %c16_i32 : i32 to vector<16x768xi32>
    %36 = arith.shrui %34, %35 : vector<16x768xi32>
    %37 = arith.xori %34, %36 : vector<16x768xi32>
    %c2146121005_i32 = arith.constant 2146121005 : i32
    %38 = vector.broadcast %c2146121005_i32 : i32 to vector<16x768xi32>
    %39 = arith.muli %37, %38 : vector<16x768xi32>
    %c15_i32 = arith.constant 15 : i32
    %40 = vector.broadcast %c15_i32 : i32 to vector<16x768xi32>
    %41 = arith.shrui %39, %40 : vector<16x768xi32>
    %42 = arith.xori %39, %41 : vector<16x768xi32>
    %c-2073254261_i32 = arith.constant -2073254261 : i32
    %43 = vector.broadcast %c-2073254261_i32 : i32 to vector<16x768xi32>
    %44 = arith.muli %42, %43 : vector<16x768xi32>
    %c16_i32_12 = arith.constant 16 : i32
    %45 = vector.broadcast %c16_i32_12 : i32 to vector<16x768xi32>
    %46 = arith.shrui %44, %45 : vector<16x768xi32>
    %47 = arith.xori %44, %46 : vector<16x768xi32>
    %c8388607_i32 = arith.constant 8388607 : i32
    %48 = vector.broadcast %c8388607_i32 : i32 to vector<16x768xi32>
    %49 = arith.andi %47, %48 : vector<16x768xi32>
    %50 = arith.sitofp %49 : vector<16x768xi32> to vector<16x768xf32>
    %cst_13 = arith.constant 1.1920929E-7 : f32
    %51 = vector.broadcast %cst_13 : f32 to vector<16x768xf32>
    %52 = arith.mulf %50, %51 : vector<16x768xf32>
    %cst_14 = arith.constant 1.000000e-01 : f32
    %53 = vector.broadcast %cst_14 : f32 to vector<16x768xf32>
    %54 = arith.cmpf oge, %52, %53 : vector<16x768xf32>
    %cst_15 = arith.constant 0.000000e+00 : f32
    %55 = vector.broadcast %cst_15 : f32 to vector<16x768xf32>
    %56 = arith.select %54, %23, %55 : vector<16x768xi1>, vector<16x768xf32>
    %c0_16 = arith.constant 0 : index
    %c0_17 = arith.constant 0 : index
    %57 = vector.load %arg7[%c0_16, %c0_17] : memref<768x128xbf16, #tpu.memory_space<vmem>>, vector<768x128xbf16>
    %c0_18 = arith.constant 0 : index
    %c0_19 = arith.constant 0 : index
    %58 = vector.load %arg8[%c0_18, %c0_19] : memref<1x128xf32, #tpu.memory_space<vmem>>, vector<1x128xf32>
    %59 = arith.truncf %56 : vector<16x768xf32> to vector<16x768xbf16>
    %cst_20 = arith.constant dense<0.000000e+00> : vector<16x128xf32>
    %60 = tpu.matmul %59, %57, %cst_20 {dimension_numbers = #tpu.dot_dimension_numbers<[1], [0], [0], [1], [0, 0, 1, 1], [], []>} : vector<16x768xbf16>, vector<768x128xbf16>, vector<16x128xf32> -> vector<16x128xf32>
    %61 = vector.broadcast %58 : vector<1x128xf32> to vector<16x128xf32>
    %62 = arith.addf %60, %61 : vector<16x128xf32>
    %63 = arith.negf %62 : vector<16x128xf32>
    %64 = math.exp %63 : vector<16x128xf32>
    %cst_21 = arith.constant 1.000000e+00 : f32
    %65 = vector.broadcast %cst_21 : f32 to vector<16x128xf32>
    %66 = arith.addf %65, %64 : vector<16x128xf32>
    %67 = arith.divf %65, %66 : vector<16x128xf32>
    %c0_22 = arith.constant 0 : index
    %c0_23 = arith.constant 0 : index
    %68 = vector.load %arg9[%c0_22, %c0_23] : memref<16x128xf32, #tpu.memory_space<vmem>>, vector<16x128xf32>
    tpu.vector_store %arg9[%c0_22, %c0_23], %67 {strides = array<i32>} : memref<16x128xf32, #tpu.memory_space<vmem>>, vector<16x128xf32>,
    return
  }
  func.func @transform_0(%arg0: i32) -> i32 {
    %c0_i32 = arith.constant 0 : i32
    %c0_i32_0 = arith.constant 0 : i32
    return %c0_i32 : i32
  }
  func.func @transform_1(%arg0: i32) -> i32 {
    %c0_i32 = arith.constant 0 : i32
    %c0_i32_0 = arith.constant 0 : i32
    return %c0_i32 : i32
  }
  func.func @transform_2(%arg0: i32) -> (i32, i32) {
    %c0_i32 = arith.constant 0 : i32
    %c0_i32_0 = arith.constant 0 : i32
    %c0_i32_1 = arith.constant 0 : i32
    return %c0_i32, %c0_i32_0 : i32, i32
  }
  func.func @transform_3(%arg0: i32) -> (i32, i32) {
    %c0_i32 = arith.constant 0 : i32
    %c0_i32_0 = arith.constant 0 : i32
    %c0_i32_1 = arith.constant 0 : i32
    return %c0_i32, %c0_i32_0 : i32, i32
  }
  func.func @transform_4(%arg0: i32) -> (i32, i32) {
    %c0_i32 = arith.constant 0 : i32
    %c0_i32_0 = arith.constant 0 : i32
    %c0_i32_1 = arith.constant 0 : i32
    return %c0_i32, %c0_i32_0 : i32, i32
  }
  func.func @transform_5(%arg0: i32) -> (i32, i32) {
    %c0_i32 = arith.constant 0 : i32
    %c0_i32_0 = arith.constant 0 : i32
    %c0_i32_1 = arith.constant 0 : i32
    return %c0_i32, %c0_i32_0 : i32, i32
  }
  func.func @transform_6(%arg0: i32) -> (i32, i32) {
    %c0_i32 = arith.constant 0 : i32
    %c0_i32_0 = arith.constant 0 : i32
    %c0_i32_1 = arith.constant 0 : i32
    return %c0_i32, %c0_i32_0 : i32, i32
  }
  func.func @transform_7(%arg0: i32) -> (i32, i32) {
    %c0_i32 = arith.constant 0 : i32
    %c0_i32_0 = arith.constant 0 : i32
    %c0_i32_1 = arith.constant 0 : i32
    return %c0_i32, %c0_i32_0 : i32, i32
  }
  func.func @transform_8(%arg0: i32) -> (i32, i32) {
    %c0_i32 = arith.constant 0 : i32
    %c0_i32_0 = arith.constant 0 : i32
    %c0_i32_1 = arith.constant 0 : i32
    return %c0_i32, %c0_i32_0 : i32, i32
  }
}

</mosaic_0001>

<bundles_post_ra>
// kernel: tpu_custom_call.1
= control target key start
LH: loop header
LB: loop body
LE: loop exit
PB: predicated region body
PF: predicated region fallthrough
CT: control target
= control target key end

     0   :  { %14 = vsyncpa [#allocation6], 0  ;;  %s4620_s0 = inlined_call_operand.hbm [shape: f32[2], index: 0, kind: input, shape index: {}]   ;;  %s4621_s1 = inlined_call_operand.<no memory space> [shape: s32[1], index: 1, kind: input, shape index: {}]   ;;  %s4622_s2 = inlined_call_operand.vmem [shape: s32[16,1], index: 2, kind: input, shape index: {}]   ;;  %s4623_s3 = inlined_call_operand.hbm [shape: bf16[16,768], index: 3, kind: input, shape index: {}]   ;;  %s4624_s4 = inlined_call_operand.hbm [shape: bf16[768,768], index: 4, kind: input, shape index: {}]   ;;  %s4625_s5 = inlined_call_operand.hbm [shape: f32[1,768], index: 5, kind: input, shape index: {}]   ;;  %s4626_s6 = inlined_call_operand.hbm [shape: bf16[768,128], index: 6, kind: input, shape index: {}]   ;;  %s4627_s7 = inlined_call_operand.hbm [shape: f32[1,128], index: 7, kind: input, shape index: {}]   ;;  %s4628_s8 = inlined_call_operand.hbm [shape: f32[16,128], index: 8, kind: output, shape index: {}]  }
   0x1   :  { %15 = vsyncpa [#allocation4], 0 }
   0x2   :  { %16 = vsyncpa [#allocation9], 0 }
   0x3   :  { %17 = vsyncpa [#allocation12], 0 }
   0x4   :  { %18 = vsyncpa [#allocation5], 0  ;;  %s4357_s27 = smov [#allocation8]   ;;  %s4358_s29 = smov [#allocation11]  }
   0x5   :  { %s48_s28 = sshll.u32 %s4357_s27, 4  ;;  %s70_s30 = sshll.u32 %s4358_s29, 4  ;;  %s49_s28 = int_to_ptr.vmem [resolvable:$true] %s48_s28  ;;  %s71_s30 = int_to_ptr.vmem [resolvable:$true] %s70_s30 }
   0x6   :  { %s4227_s9 = scalar_lea.vmem %s49_s28, 36864  ;;  %p4232_p1 = scmp.lt.s32.totalorder %s49_s28, %s49_s28 }
   0x7   :  { %p4228_p0 = scmp.ne.s32.totalorder %s49_s28, %s4227_s9  ;;  %p4233_p2 = scmp.lt.s32.totalorder %s4227_s9, %s4227_s9 }
   0x9   :  { %p4234_p3 = por %p4233_p2, %p4232_p1 }
   0xb   :  { %p4235_p4 = pnand %p4234_p3, %p4228_p0 }
   0xd   :  { %4238 = shalt.err (!%p4235_p4)
}
   0xe   :  { %s4359_s10 = smov 384   ;;  %s4360_s11 = smov 24  }
   0xf   :  { %54 = dma.hbm_to_vmem [thread:$0]  %s4624_s4, 36864, %s49_s28, [#allocation9], %s4359_s10, %s4359_s10, %s4360_s11  }
  0x10   :  { %s4247_s14 = scalar_lea.vmem %s71_s30, 6144  ;;  %p4252_p6 = scmp.lt.s32.totalorder %s71_s30, %s71_s30 }
  0x11   :  { %p4248_p5 = scmp.ne.s32.totalorder %s71_s30, %s4247_s14  ;;  %p4253_p7 = scmp.lt.s32.totalorder %s4247_s14, %s4247_s14 }
  0x13   :  { %p4254_p8 = por %p4253_p7, %p4252_p6 }
  0x15   :  { %p4255_p9 = pnand %p4254_p8, %p4248_p5 }
  0x17   :  { %4258 = shalt.err (!%p4255_p9)
}
  0x18   :  { %s4361_s15 = smov 64   ;;  %s4362_s16 = smov 4  }
  0x19   :  { %76 = dma.hbm_to_vmem [thread:$0]  %s4626_s6, 6144, %s71_s30, [#allocation12], %s4361_s15, %s4361_s15, %s4362_s16  }
  0x1a   :  { %s4363_s19 = smov [#allocation3]   ;;  %s4364_s22 = smov [#allocation7]  }
  0x1b   :  { %26 = dma.hbm_to_smem %s4620_s0, 16, %s4363_s19, [#allocation6]  }
  0x1c   :  { %s36_s4 = sshll.u32 %s4364_s22, 4  ;;  %s4365_s23 = smov [#allocation10]   ;;  %s37_s4 = int_to_ptr.vmem [resolvable:$true] %s36_s4 }
  0x1d   :  { %s61_s24 = sshll.u32 %s4365_s23, 4  ;;  %s4275_s25 = scalar_lea.vmem %s37_s4, 768  ;;  %s62_s24 = int_to_ptr.vmem [resolvable:$true] %s61_s24 }
  0x1e   :  { %p4276_p10 = scmp.ne.s32.totalorder %s37_s4, %s4275_s25  ;;  %p4280_p11 = scmp.lt.s32.totalorder %s37_s4, %s37_s4 }
  0x1f   :  { %p4281_p12 = scmp.lt.s32.totalorder %s4275_s25, %s4275_s25 }
  0x21   :  { %p4282_p13 = por %p4281_p12, %p4280_p11 }
  0x23   :  { %p4283_p0 = pnand %p4282_p13, %p4276_p10 }
  0x25   :  { %4286 = shalt.err (!%p4283_p0)
}
  0x26   :  { %42 = dma.hbm_to_vmem [thread:$0]  %s4623_s3, 768, %s37_s4, [#allocation4], %s4359_s10, %s4359_s10, %s4360_s11  }
  0x27   :  { %s4295_s0 = scalar_lea.vmem %s62_s24, 96  ;;  %p4300_p2 = scmp.lt.s32.totalorder %s62_s24, %s62_s24 }
  0x28   :  { %p4296_p1 = scmp.ne.s32.totalorder %s62_s24, %s4295_s0  ;;  %p4301_p3 = scmp.lt.s32.totalorder %s4295_s0, %s4295_s0 }
  0x2a   :  { %p4302_p4 = por %p4301_p3, %p4300_p2 }
  0x2c   :  { %p4303_p5 = pnand %p4302_p4, %p4296_p1 }
  0x2e   :  { %4306 = shalt.err (!%p4303_p5)
}
  0x2f   :  { %64 = dma.hbm_to_vmem [thread:$0]  %s4625_s5, 96, %s62_s24, [#allocation9]  }
  0x30   :  { %s4366_s29 = smov [#allocation13]  }
  0x31   :  { %s83_s30 = sshll.u32 %s4366_s29, 4  ;;  %s84_s30 = int_to_ptr.vmem [resolvable:$true] %s83_s30 }
  0x32   :  { %s4315_s9 = scalar_lea.vmem %s84_s30, 16  ;;  %s4319_s12 = scalar_lea.vmem %s84_s30, 32 }
  0x33   :  { %p4316_p6 = scmp.ne.s32.totalorder %s84_s30, %s4315_s9  ;;  %p4320_p7 = scmp.lt.s32.totalorder %s84_s30, %s84_s30 }
  0x34   :  { %p4321_p8 = scmp.lt.s32.totalorder %s4319_s12, %s4315_s9 }
  0x36   :  { %p4322_p9 = por %p4321_p8, %p4320_p7 }
  0x38   :  { %p4323_p10 = pnand %p4322_p9, %p4316_p6 }
  0x3a   :  { %4326 = shalt.err (!%p4323_p10)
}
  0x3b   :  { %86 = dma.hbm_to_vmem [thread:$0]  %s4627_s7, 16, %s84_s30, [#allocation12]  }
  0x3c   :  { %4347 = dma.done.wait [#allocation6], 16  }
  0x3d   :  { %4348 = vsyncadd [#allocation6], 4294967280 }
  0x3e   :  { %4349 = dma.done.wait [#allocation4], 768  }
  0x3f   :  { %4350 = vsyncadd [#allocation4], 4294966528 }
  0x40   :  { %4351 = dma.done.wait [#allocation9], 36960  }
  0x41   :  { %4352 = vsyncadd [#allocation9], 4294930336 }
  0x42   :  { %4353 = dma.done.wait [#allocation12], 6160  }
  0x43   :  { %4354 = vsyncadd [#allocation12], 4294961136 }
  0x44   :  { %105 = sfence }
  0x45   :  { %v3692_v0 = vld [vmem:[#allocation8 + $0x154] ss:$24 sps:$4 sm:$0xff]   ;;  %v3694_v1 = vld [vmem:[#allocation8 + $0x150] ss:$24 sps:$4 sm:$0xff]   ;;  %v3698_v4 = vld [vmem:[#allocation8 + $0x124] ss:$24 sps:$4 sm:$0xff]  }
  0x46   :  { %1903 = vmatprep.subr.bf16.mxu0 %v3692_v0  ;;  %v3695_v2 = vld [vmem:[#allocation8 + $0x454] ss:$24 sps:$4 sm:$0xff]   ;;  %v3697_v3 = vld [vmem:[#allocation8 + $0x450] ss:$24 sps:$4 sm:$0xff]   ;;  %v3700_v5 = vld [vmem:[#allocation8 + $0x120] ss:$24 sps:$4 sm:$0xff]  }
  0x47   :  { %1904 = vmatpush1.bf16.msra.mxu0 %v3694_v1  ;;  %1946 = vmatprep.subr.bf16.mxu1 %v3695_v2  ;;  %v3701_v6 = vld [vmem:[#allocation8 + $0x424] ss:$24 sps:$4 sm:$0xff]   ;;  %v3703_v7 = vld [vmem:[#allocation8 + $0x420] ss:$24 sps:$4 sm:$0xff]   ;;  %v3704_v8 = vld [vmem:[#allocation8 + $0xf4] ss:$24 sps:$4 sm:$0xff]  }
  0x48   :  { %1947 = vmatpush1.bf16.msra.mxu1 %v3697_v3  ;;  %1905 = vmatprep.subr.bf16.mxu0 %v3698_v4  ;;  %v3706_v9 = vld [vmem:[#allocation8 + $0xf0] ss:$24 sps:$4 sm:$0xff]   ;;  %v3707_v10 = vld [vmem:[#allocation8 + $0x3f4] ss:$24 sps:$4 sm:$0xff]   ;;  %v3710_v11 = vld [vmem:[#allocation8 + $0xc4] ss:$24 sps:$4 sm:$0xff]  }
  0x49   :  { %1948 = vmatprep.subr.bf16.mxu1 %v3701_v6  ;;  %v3709_v12 = vld [vmem:[#allocation8 + $0x3f0] ss:$24 sps:$4 sm:$0xff]   ;;  %v3713_v13 = vld [vmem:[#allocation8 + $0x3c4] ss:$24 sps:$4 sm:$0xff]   ;;  %v3712_v14 = vld [vmem:[#allocation8 + $0xc0] ss:$24 sps:$4 sm:$0xff]  }
  0x4a   :  { %v3716_v15 = vld [vmem:[#allocation8 + $0x94] ss:$24 sps:$4 sm:$0xff]   ;;  %v3715_v16 = vld [vmem:[#allocation8 + $0x3c0] ss:$24 sps:$4 sm:$0xff]   ;;  %v3718_v18 = vld [vmem:[#allocation8 + $0x90] ss:$24 sps:$4 sm:$0xff]  }
  0x4b   :  { %1906 = vmatpush1.bf16.msra.mxu0 %v3700_v5  ;;  %v3719_v17 = vld [vmem:[#allocation8 + $0x394] ss:$24 sps:$4 sm:$0xff]   ;;  %v3722_v19 = vld [vmem:[#allocation8 + $0x64] ss:$24 sps:$4 sm:$0xff]   ;;  %v3721_v20 = vld [vmem:[#allocation8 + $0x390] ss:$24 sps:$4 sm:$0xff]  }
  0x4c   :  { %1907 = vmatprep.subr.bf16.mxu0 %v3704_v8  ;;  %1949 = vmatpush1.bf16.msra.mxu1 %v3703_v7  ;;  %v3725_v21 = vld [vmem:[#allocation8 + $0x364] ss:$24 sps:$4 sm:$0xff]   ;;  %v3724_v22 = vld [vmem:[#allocation8 + $0x60] ss:$24 sps:$4 sm:$0xff]   ;;  %v3728_v23 = vld [vmem:[#allocation8 + $0x34] ss:$24 sps:$4 sm:$0xff]  }
  0x4d   :  { %1950 = vmatprep.subr.bf16.mxu1 %v3707_v10  ;;  %v3727_v24 = vld [vmem:[#allocation8 + $0x360] ss:$24 sps:$4 sm:$0xff]   ;;  %v3731_v25 = vld [vmem:[#allocation8 + $0x334] ss:$24 sps:$4 sm:$0xff]   ;;  %v3730_v26 = vld [vmem:[#allocation8 + $0x30] ss:$24 sps:$4 sm:$0xff]  }
  0x4e   :  { %v3734_v27 = vld [vmem:[#allocation8 + $0x4] ss:$24 sps:$4 sm:$0xff]   ;;  %v3733_v28 = vld [vmem:[#allocation8 + $0x330] ss:$24 sps:$4 sm:$0xff]   ;;  %v3736_v30 = vld [vmem:[#allocation8] ss:$24 sps:$4 sm:$0xff]  }
  0x4f   :  { %1908 = vmatpush1.bf16.msra.mxu0 %v3706_v9  ;;  %v3737_v29 = vld [vmem:[#allocation8 + $0x304] ss:$24 sps:$4 sm:$0xff]   ;;  %v3740_v31 = vld [vmem:[#allocation8 + $0x2d4] ss:$24 sps:$4 sm:$0xff]   ;;  %v3739_v32 = vld [vmem:[#allocation8 + $0x300] ss:$24 sps:$4 sm:$0xff]  }
  0x50   :  { %1909 = vmatprep.subr.bf16.mxu0 %v3710_v11  ;;  %1951 = vmatpush1.bf16.msra.mxu1 %v3709_v12  ;;  %v3743_v33 = vld [vmem:[#allocation8 + $0x5d4] ss:$24 sps:$4 sm:$0xff]   ;;  %v3742_v34 = vld [vmem:[#allocation8 + $0x2d0] ss:$24 sps:$4 sm:$0xff]   ;;  %v3746_v35 = vld [vmem:[#allocation8 + $0x2a4] ss:$24 sps:$4 sm:$0xff]  }
  0x51   :  { %1952 = vmatprep.subr.bf16.mxu1 %v3713_v13  ;;  %v3745_v36 = vld [vmem:[#allocation8 + $0x5d0] ss:$24 sps:$4 sm:$0xff]   ;;  %v3749_v37 = vld [vmem:[#allocation8 + $0x5a4] ss:$24 sps:$4 sm:$0xff]   ;;  %v3748_v38 = vld [vmem:[#allocation8 + $0x2a0] ss:$24 sps:$4 sm:$0xff]  }
  0x52   :  { %v3752_v39 = vld [vmem:[#allocation8 + $0x274] ss:$24 sps:$4 sm:$0xff]   ;;  %v3751_v40 = vld [vmem:[#allocation8 + $0x5a0] ss:$24 sps:$4 sm:$0xff]   ;;  %v3754_v42 = vld [vmem:[#allocation8 + $0x270] ss:$24 sps:$4 sm:$0xff]  }
  0x53   :  { %1910 = vmatpush1.bf16.msra.mxu0 %v3712_v14  ;;  %v3755_v41 = vld [vmem:[#allocation8 + $0x574] ss:$24 sps:$4 sm:$0xff]   ;;  %v3758_v43 = vld [vmem:[#allocation8 + $0x244] ss:$24 sps:$4 sm:$0xff]   ;;  %v3757_v44 = vld [vmem:[#allocation8 + $0x570] ss:$24 sps:$4 sm:$0xff]  }
  0x54   :  { %1911 = vmatprep.subr.bf16.mxu0 %v3716_v15  ;;  %1953 = vmatpush1.bf16.msra.mxu1 %v3715_v16  ;;  %v3761_v45 = vld [vmem:[#allocation8 + $0x544] ss:$24 sps:$4 sm:$0xff]   ;;  %v3760_v46 = vld [vmem:[#allocation8 + $0x240] ss:$24 sps:$4 sm:$0xff]   ;;  %v3787_v47 = vld [vmem:[#allocation7 + $0x4] ss:$24 sps:$4 sm:$0xff]  }
  0x55   :  { %1954 = vmatprep.subr.bf16.mxu1 %v3719_v17  ;;  %v3764_v48 = vld [vmem:[#allocation8 + $0x214] ss:$24 sps:$4 sm:$0xff]   ;;  %v3763_v49 = vld [vmem:[#allocation8 + $0x540] ss:$24 sps:$4 sm:$0xff]   ;;  %1935 = vmatprep.mubr.bf16.mxu0 %v3787_v47  ;;  %v3766_v52 = vld [vmem:[#allocation8 + $0x210] ss:$24 sps:$4 sm:$0xff]  }
  0x56   :  { %v3767_v50 = vld [vmem:[#allocation8 + $0x514] ss:$24 sps:$4 sm:$0xff]   ;;  %v3770_v53 = vld [vmem:[#allocation8 + $0x1e4] ss:$24 sps:$4 sm:$0xff]   ;;  %v3769_v54 = vld [vmem:[#allocation8 + $0x510] ss:$24 sps:$4 sm:$0xff]  }
  0x57   :  { %1912 = vmatpush1.bf16.msra.mxu0 %v3718_v18  ;;  %v4441_v51 = vld [vmem:[#allocation7 + $0xc] ss:$24 sps:$4 sm:$0xff]   ;;  %v3772_v56 = vld [vmem:[#allocation8 + $0x1e0] ss:$24 sps:$4 sm:$0xff]   ;;  %v3778_v60 = vld [vmem:[#allocation8 + $0x1b0] ss:$24 sps:$4 sm:$0xff]  }
  0x58   :  { %1913 = vmatprep.subr.bf16.mxu0 %v3722_v19  ;;  %1955 = vmatpush1.bf16.msra.mxu1 %v3721_v20  ;;  %v3773_v55 = vld [vmem:[#allocation8 + $0x4e4] ss:$24 sps:$4 sm:$0xff]   ;;  %v3776_v57 = vld [vmem:[#allocation8 + $0x1b4] ss:$24 sps:$4 sm:$0xff]   ;;  %v3775_v58 = vld [vmem:[#allocation8 + $0x4e0] ss:$24 sps:$4 sm:$0xff]  }
  0x59   :  { %1956 = vmatprep.subr.bf16.mxu1 %v3725_v21  ;;  %1978 = vmatprep.mubr.bf16.mxu1 %v4441_v51  ;;  %v3779_v59 = vld [vmem:[#allocation8 + $0x4b4] ss:$24 sps:$4 sm:$0xff]   ;;  %v3782_v61 = vld [vmem:[#allocation8 + $0x184] ss:$24 sps:$4 sm:$0xff]   ;;  %v3781_v62 = vld [vmem:[#allocation8 + $0x4b0] ss:$24 sps:$4 sm:$0xff]  }
  0x5a   :  { %v3785_v63 = vld [vmem:[#allocation8 + $0x484] ss:$24 sps:$4 sm:$0xff]   ;;  %v3784_v0 = vld [vmem:[#allocation8 + $0x180] ss:$24 sps:$4 sm:$0xff]   ;;  %v3793_v1 = vld [vmem:[#allocation8 + $0x754] ss:$24 sps:$4 sm:$0xff]  }
  0x5b   :  { %1914 = vmatpush1.bf16.msra.mxu0 %v3724_v22  ;;  %v3789_v2 = vld [vmem:[#allocation8 + $0x480] ss:$24 sps:$4 sm:$0xff]   ;;  %v4444_v3 = vld [vmem:[#allocation7] ss:$24 sps:$4 sm:$0xff]   ;;  %v3799_v4 = vld [vmem:[#allocation8 + $0x15c] ss:$24 sps:$4 sm:$0xff]  }
  0x5c   :  { %1915 = vmatprep.subr.bf16.mxu0 %v3728_v23  ;;  %1957 = vmatpush1.bf16.msra.mxu1 %v3727_v24  ;;  %v3791_v5 = vld [vmem:[#allocation8 + $0x750] ss:$24 sps:$4 sm:$0xff]   ;;  %v3802_v7 = vld [vmem:[#allocation8 + $0x724] ss:$24 sps:$4 sm:$0xff]   ;;  %v3800_v10 = vld [vmem:[#allocation8 + $0x720] ss:$24 sps:$4 sm:$0xff]  }
  0x5d   :  { %1958 = vmatprep.subr.bf16.mxu1 %v3731_v25  ;;  %v4446_v6 = vld [vmem:[#allocation7 + $0x8] ss:$24 sps:$4 sm:$0xff]   ;;  %v3805_v9 = vld [vmem:[#allocation8 + $0x12c] ss:$24 sps:$4 sm:$0xff]   ;;  %v3803_v12 = vld [vmem:[#allocation8 + $0x128] ss:$24 sps:$4 sm:$0xff]  }
  0x5e   :  { %v3797_v8 = vld [vmem:[#allocation8 + $0x158] ss:$24 sps:$4 sm:$0xff]   ;;  %v3808_v11 = vld [vmem:[#allocation8 + $0x6f4] ss:$24 sps:$4 sm:$0xff]   ;;  %v3814_v15 = vld [vmem:[#allocation8 + $0x6c4] ss:$24 sps:$4 sm:$0xff]  }
  0x5f   :  { %1916 = vmatpush1.bf16.msra.mxu0 %v3730_v26  ;;  %v3811_v13 = vld [vmem:[#allocation8 + $0xfc] ss:$24 sps:$4 sm:$0xff]   ;;  %v3806_v14 = vld [vmem:[#allocation8 + $0x6f0] ss:$24 sps:$4 sm:$0xff]   ;;  %v3817_v17 = vld [vmem:[#allocation8 + $0xcc] ss:$24 sps:$4 sm:$0xff]  }
  0x60   :  { %1917 = vmatprep.subr.bf16.mxu0 %v3734_v27  ;;  %1959 = vmatpush1.bf16.msra.mxu1 %v3733_v28  ;;  %v3809_v16 = vld [vmem:[#allocation8 + $0xf8] ss:$24 sps:$4 sm:$0xff]   ;;  %v3820_v19 = vld [vmem:[#allocation8 + $0x694] ss:$24 sps:$4 sm:$0xff]   ;;  %v3815_v20 = vld [vmem:[#allocation8 + $0xc8] ss:$24 sps:$4 sm:$0xff]  }
  0x61   :  { %1960 = vmatprep.subr.bf16.mxu1 %v3737_v29  ;;  %v3812_v18 = vld [vmem:[#allocation8 + $0x6c0] ss:$24 sps:$4 sm:$0xff]   ;;  %v3823_v21 = vld [vmem:[#allocation8 + $0x9c] ss:$24 sps:$4 sm:$0xff]   ;;  %v3818_v22 = vld [vmem:[#allocation8 + $0x690] ss:$24 sps:$4 sm:$0xff]  }
  0x62   :  { %v3826_v23 = vld [vmem:[#allocation8 + $0x664] ss:$24 sps:$4 sm:$0xff]   ;;  %v3821_v24 = vld [vmem:[#allocation8 + $0x98] ss:$24 sps:$4 sm:$0xff]   ;;  %v3832_v27 = vld [vmem:[#allocation8 + $0x634] ss:$24 sps:$4 sm:$0xff]  }
  0x63   :  { %1918 = vmatpush1.bf16.msra.mxu0 %v3736_v30  ;;  %v3829_v25 = vld [vmem:[#allocation8 + $0x6c] ss:$24 sps:$4 sm:$0xff]   ;;  %v3824_v26 = vld [vmem:[#allocation8 + $0x660] ss:$24 sps:$4 sm:$0xff]   ;;  %v3835_v29 = vld [vmem:[#allocation8 + $0x3c] ss:$24 sps:$4 sm:$0xff]  }
  0x64   :  { %1919 = vmatprep.subr.bf16.mxu0 %v3740_v31  ;;  %1961 = vmatpush1.bf16.msra.mxu1 %v3739_v32  ;;  %v3827_v28 = vld [vmem:[#allocation8 + $0x68] ss:$24 sps:$4 sm:$0xff]   ;;  %v3833_v31 = vld [vmem:[#allocation8 + $0x38] ss:$24 sps:$4 sm:$0xff]   ;;  %v3838_v32 = vld [vmem:[#allocation8 + $0x604] ss:$24 sps:$4 sm:$0xff]  }
  0x65   :  { %1962 = vmatprep.subr.bf16.mxu1 %v3743_v33  ;;  %v3830_v30 = vld [vmem:[#allocation8 + $0x630] ss:$24 sps:$4 sm:$0xff]   ;;  %v4450_v33 = vld [vmem:[#allocation7 + $0x14] ss:$24 sps:$4 sm:$0xff]   ;;  %vm2323_vm2 = vcmask 130048   ;;  %s2456_s16 = sld [smem:[#allocation3]] }
  0x66   :  { %s2519_s15 = smul.u32 2654435769, %s4621_s1  ;;  %s3540_s1 = sld [smem:[#allocation3 + $0x1]] }
  0x67   :  { %1920 = vmatpush2.bf16.msra.mxu0 %v3742_v34  ;;  %v3841_v34 = vld [vmem:[#allocation8 + $0xc] ss:$24 sps:$4 sm:$0xff]   ;;  %s4369_s17 = smov [#allocation14]  }
  0x68   :  { %1921 = vmatprep.subr.bf16.mxu0 %v3746_v35  ;;  %1963 = vmatpush2.bf16.msra.mxu1 %v3745_v36  ;;  %v4367_v35 = vmov 0   ;;  %v3836_v36 = vld [vmem:[#allocation8 + $0x600] ss:$24 sps:$4 sm:$0xff]   ;;  %s3228_s18 = sshll.u32 %s4369_s17, 4  ;;  %s3229_s18 = int_to_ptr.vmem [resolvable:$true] %s3228_s18 }
  0x69   :  { %1964 = vmatprep.subr.bf16.mxu1 %v3749_v37  ;;  %3691 = vset.pattern.permute.xlu0 %v4367_v35  ;;  %v3844_v37 = vld [vmem:[#allocation8 + $0x8d4] ss:$24 sps:$4 sm:$0xff]   ;;  %s4327_s19 = scalar_lea.vmem %s3229_s18, 256  ;;  %p4332_p12 = scmp.lt.s32.totalorder %s3229_s18, %s3229_s18 }
  0x6a   :  { %p4328_p11 = scmp.ne.s32.totalorder %s3229_s18, %s4327_s19  ;;  %p4333_p13 = scmp.lt.s32.totalorder %s4327_s19, %s4327_s19 }
  0x6b   :  { %1922 = vmatpush2.bf16.msra.mxu0 %v3748_v38  ;;  %v3839_v38 = vld [vmem:[#allocation8 + $0x8] ss:$24 sps:$4 sm:$0xff]  }
  0x6c   :  { %1923 = vmatprep.subr.bf16.mxu0 %v3752_v39  ;;  %1965 = vmatpush2.bf16.msra.mxu1 %v3751_v40  ;;  %v3847_v39 = vld [vmem:[#allocation8 + $0x2dc] ss:$24 sps:$4 sm:$0xff]   ;;  %v3842_v40 = vld [vmem:[#allocation8 + $0x8d0] ss:$24 sps:$4 sm:$0xff]   ;;  %p4334_p0 = por %p4333_p13, %p4332_p12 }
  0x6d   :  { %1966 = vmatprep.subr.bf16.mxu1 %v3755_v41  ;;  %v3850_v41 = vld [vmem:[#allocation8 + $0x8a4] ss:$24 sps:$4 sm:$0xff]  }
  0x6e   :  { %p4335_p1 = pnand %p4334_p0, %p4328_p11 }
  0x6f   :  { %1924 = vmatpush2.bf16.msra.mxu0 %v3754_v42  ;;  %v3845_v42 = vld [vmem:[#allocation8 + $0x2d8] ss:$24 sps:$4 sm:$0xff]  }
  0x70   :  { %1925 = vmatprep.subr.bf16.mxu0 %v3758_v43  ;;  %1967 = vmatpush2.bf16.msra.mxu1 %v3757_v44  ;;  %v3853_v43 = vld [vmem:[#allocation8 + $0x2ac] ss:$24 sps:$4 sm:$0xff]   ;;  %v3848_v44 = vld [vmem:[#allocation8 + $0x8a0] ss:$24 sps:$4 sm:$0xff]  }
  0x71   :  { %1968 = vmatprep.subr.bf16.mxu1 %v3761_v45  ;;  %v3856_v45 = vld [vmem:[#allocation8 + $0x874] ss:$24 sps:$4 sm:$0xff]  }
  0x73   :  { %1926 = vmatpush2.bf16.msra.mxu0 %v3760_v46  ;;  %v3851_v46 = vld [vmem:[#allocation8 + $0x2a8] ss:$24 sps:$4 sm:$0xff]  }
  0x74   :  { %1927 = vmatprep.subr.bf16.mxu0 %v3764_v48  ;;  %1969 = vmatpush2.bf16.msra.mxu1 %v3763_v49  ;;  %v3854_v48 = vld [vmem:[#allocation8 + $0x870] ss:$24 sps:$4 sm:$0xff]   ;;  %v3862_v49 = vld [vmem:[#allocation8 + $0x844] ss:$24 sps:$4 sm:$0xff]  }
  0x75   :  { %1970 = vmatprep.subr.bf16.mxu1 %v3767_v50  ;;  %v3857_v50 = vld [vmem:[#allocation8 + $0x278] ss:$24 sps:$4 sm:$0xff]  }
  0x77   :  { %1928 = vmatpush2.bf16.msra.mxu0 %v3766_v52  ;;  %v3865_v52 = vld [vmem:[#allocation8 + $0x24c] ss:$24 sps:$4 sm:$0xff]  }
  0x78   :  { %1929 = vmatprep.subr.bf16.mxu0 %v3770_v53  ;;  %1971 = vmatpush2.bf16.msra.mxu1 %v3769_v54  ;;  %v3860_v53 = vld [vmem:[#allocation8 + $0x840] ss:$24 sps:$4 sm:$0xff]   ;;  %v3868_v54 = vld [vmem:[#allocation8 + $0x814] ss:$24 sps:$4 sm:$0xff]  }
  0x79   :  { %1972 = vmatprep.subr.bf16.mxu1 %v3773_v55  ;;  %v3863_v55 = vld [vmem:[#allocation8 + $0x248] ss:$24 sps:$4 sm:$0xff]  }
  0x7b   :  { %1930 = vmatpush2.bf16.msra.mxu0 %v3772_v56  ;;  %v3871_v56 = vld [vmem:[#allocation8 + $0x21c] ss:$24 sps:$4 sm:$0xff]  }
  0x7c   :  { %1931 = vmatprep.subr.bf16.mxu0 %v3776_v57  ;;  %1973 = vmatpush2.bf16.msra.mxu1 %v3775_v58  ;;  %v3866_v57 = vld [vmem:[#allocation8 + $0x810] ss:$24 sps:$4 sm:$0xff]   ;;  %v3874_v58 = vld [vmem:[#allocation8 + $0x7e4] ss:$24 sps:$4 sm:$0xff]  }
  0x7d   :  { %1974 = vmatprep.subr.bf16.mxu1 %v3779_v59  ;;  %v3869_v59 = vld [vmem:[#allocation8 + $0x218] ss:$24 sps:$4 sm:$0xff]  }
  0x7f   :  { %1932 = vmatpush2.bf16.msra.mxu0 %v3778_v60  ;;  %v3877_v60 = vld [vmem:[#allocation8 + $0x1ec] ss:$24 sps:$4 sm:$0xff]  }
  0x80   :  { %1933 = vmatprep.subr.bf16.mxu0 %v3782_v61  ;;  %1975 = vmatpush2.bf16.msra.mxu1 %v3781_v62  ;;  %v3872_v61 = vld [vmem:[#allocation8 + $0x7e0] ss:$24 sps:$4 sm:$0xff]   ;;  %v3880_v62 = vld [vmem:[#allocation8 + $0x7b4] ss:$24 sps:$4 sm:$0xff]  }
  0x81   :  { %1976 = vmatprep.subr.bf16.mxu1 %v3785_v63  ;;  %v3875_v63 = vld [vmem:[#allocation8 + $0x1e8] ss:$24 sps:$4 sm:$0xff]  }
  0x83   :  { %1934 = vmatpush2.bf16.msra.mxu0 %v3784_v0  ;;  %v3883_v0 = vld [vmem:[#allocation8 + $0x1bc] ss:$24 sps:$4 sm:$0xff]  }
  0x84   :  { %1989 = vmatprep.subr.bf16.mxu0 %v3793_v1  ;;  %1977 = vmatpush2.bf16.msra.mxu1 %v3789_v2  ;;  %v3878_v1 = vld [vmem:[#allocation8 + $0x7b0] ss:$24 sps:$4 sm:$0xff]   ;;  %v3886_v2 = vld [vmem:[#allocation8 + $0x784] ss:$24 sps:$4 sm:$0xff]  }
  0x85   :  { %2032 = vmatprep.subr.bf16.mxu1 %v3799_v4  ;;  %v3881_v4 = vld [vmem:[#allocation8 + $0x1b8] ss:$24 sps:$4 sm:$0xff]  }
  0x86   :  { %1936 = vmatmul.mubr.bf16.vlgmr.msra.gmra.mxu0 %v4444_v3 }
  0x87   :  { %1990 = vmatpush1.bf16.msra.mxu0 %v3791_v5  ;;  %1979 = vmatmul.mubr.bf16.vlgmr.msra.gmra.mxu1 %v4446_v6  ;;  %v3889_v5 = vld [vmem:[#allocation8 + $0x18c] ss:$24 sps:$4 sm:$0xff]  }
  0x88   :  { %1991 = vmatprep.subr.bf16.mxu0 %v3802_v7  ;;  %2033 = vmatpush1.bf16.msra.mxu1 %v3797_v8  ;;  %v3884_v7 = vld [vmem:[#allocation8 + $0x780] ss:$24 sps:$4 sm:$0xff]   ;;  %v3895_v8 = vld [vmem:[#allocation8 + $0x45c] ss:$24 sps:$4 sm:$0xff]  }
  0x89   :  { %2064 = vmatprep.mubr.bf16.mxu1 %v3787_v47  ;;  %2034 = vmatprep.subr.bf16.mxu1 %v3805_v9  ;;  %v3859_v47 = vld [vmem:[#allocation8 + $0x27c] ss:$24 sps:$4 sm:$0xff]   ;;  %v3887_v9 = vld [vmem:[#allocation8 + $0x188] ss:$24 sps:$4 sm:$0xff]  }
  0x8a   :  { %2021 = vmatprep.mubr.bf16.mxu0 %v4450_v33 }
  0x8b   :  { %1992 = vmatpush1.bf16.msra.mxu0 %v3800_v10  ;;  %v4454_v10 = vld [vmem:[#allocation7 + $0x10] ss:$24 sps:$4 sm:$0xff]  }
  0x8c   :  { %1993 = vmatprep.subr.bf16.mxu0 %v3808_v11  ;;  %2035 = vmatpush1.bf16.msra.mxu1 %v3803_v12  ;;  %v3898_v11 = vld [vmem:[#allocation8 + $0x75c] ss:$24 sps:$4 sm:$0xff]   ;;  %v3893_v12 = vld [vmem:[#allocation8 + $0x458] ss:$24 sps:$4 sm:$0xff]  }
  0x8d   :  { %2036 = vmatprep.subr.bf16.mxu1 %v3811_v13  ;;  %v3901_v13 = vld [vmem:[#allocation8 + $0x42c] ss:$24 sps:$4 sm:$0xff]  }
  0x8f   :  { %1994 = vmatpush1.bf16.msra.mxu0 %v3806_v14  ;;  %v3896_v14 = vld [vmem:[#allocation8 + $0x758] ss:$24 sps:$4 sm:$0xff]  }
  0x90   :  { %1995 = vmatprep.subr.bf16.mxu0 %v3814_v15  ;;  %2037 = vmatpush1.bf16.msra.mxu1 %v3809_v16  ;;  %v3904_v15 = vld [vmem:[#allocation8 + $0x72c] ss:$24 sps:$4 sm:$0xff]   ;;  %v3899_v16 = vld [vmem:[#allocation8 + $0x428] ss:$24 sps:$4 sm:$0xff]  }
  0x91   :  { %2038 = vmatprep.subr.bf16.mxu1 %v3817_v17  ;;  %v3907_v17 = vld [vmem:[#allocation8 + $0x3fc] ss:$24 sps:$4 sm:$0xff]  }
  0x93   :  { %1996 = vmatpush1.bf16.msra.mxu0 %v3812_v18  ;;  %v3902_v18 = vld [vmem:[#allocation8 + $0x728] ss:$24 sps:$4 sm:$0xff]  }
  0x94   :  { %1997 = vmatprep.subr.bf16.mxu0 %v3820_v19  ;;  %2039 = vmatpush1.bf16.msra.mxu1 %v3815_v20  ;;  %v3910_v19 = vld [vmem:[#allocation8 + $0x6fc] ss:$24 sps:$4 sm:$0xff]   ;;  %v3905_v20 = vld [vmem:[#allocation8 + $0x3f8] ss:$24 sps:$4 sm:$0xff]  }
  0x95   :  { %2040 = vmatprep.subr.bf16.mxu1 %v3823_v21  ;;  %v3913_v21 = vld [vmem:[#allocation8 + $0x3cc] ss:$24 sps:$4 sm:$0xff]  }
  0x97   :  { %1998 = vmatpush1.bf16.msra.mxu0 %v3818_v22  ;;  %v3908_v22 = vld [vmem:[#allocation8 + $0x6f8] ss:$24 sps:$4 sm:$0xff]  }
  0x98   :  { %1999 = vmatprep.subr.bf16.mxu0 %v3826_v23  ;;  %2041 = vmatpush1.bf16.msra.mxu1 %v3821_v24  ;;  %v3916_v23 = vld [vmem:[#allocation8 + $0x6cc] ss:$24 sps:$4 sm:$0xff]   ;;  %v3914_v24 = vld [vmem:[#allocation8 + $0x6c8] ss:$24 sps:$4 sm:$0xff]  }
  0x99   :  { %2042 = vmatprep.subr.bf16.mxu1 %v3829_v25  ;;  %v3922_v25 = vld [vmem:[#allocation8 + $0x69c] ss:$24 sps:$4 sm:$0xff]  }
  0x9b   :  { %2000 = vmatpush1.bf16.msra.mxu0 %v3824_v26  ;;  %v3917_v26 = vld [vmem:[#allocation8 + $0x398] ss:$24 sps:$4 sm:$0xff]  }
  0x9c   :  { %2001 = vmatprep.subr.bf16.mxu0 %v3832_v27  ;;  %2043 = vmatpush1.bf16.msra.mxu1 %v3827_v28  ;;  %v3925_v27 = vld [vmem:[#allocation8 + $0x36c] ss:$24 sps:$4 sm:$0xff]   ;;  %v3920_v28 = vld [vmem:[#allocation8 + $0x698] ss:$24 sps:$4 sm:$0xff]  }
  0x9d   :  { %2044 = vmatprep.subr.bf16.mxu1 %v3835_v29  ;;  %v3928_v29 = vld [vmem:[#allocation8 + $0x66c] ss:$24 sps:$4 sm:$0xff]  }
  0x9f   :  { %2002 = vmatpush1.bf16.msra.mxu0 %v3830_v30  ;;  %v3923_v30 = vld [vmem:[#allocation8 + $0x368] ss:$24 sps:$4 sm:$0xff]  }
  0xa0   :  { %2003 = vmatprep.subr.bf16.mxu0 %v3838_v32  ;;  %2045 = vmatpush1.bf16.msra.mxu1 %v3833_v31  ;;  %v3931_v31 = vld [vmem:[#allocation8 + $0x33c] ss:$24 sps:$4 sm:$0xff]   ;;  %v3926_v32 = vld [vmem:[#allocation8 + $0x668] ss:$24 sps:$4 sm:$0xff]  }
  0xa1   :  { %2046 = vmatprep.subr.bf16.mxu1 %v3841_v34  ;;  %v3934_v34 = vld [vmem:[#allocation8 + $0x63c] ss:$24 sps:$4 sm:$0xff]  }
  0xa3   :  { %2004 = vmatpush1.bf16.msra.mxu0 %v3836_v36  ;;  %v3929_v36 = vld [vmem:[#allocation8 + $0x338] ss:$24 sps:$4 sm:$0xff]  }
  0xa4   :  { %2005 = vmatprep.subr.bf16.mxu0 %v3844_v37  ;;  %2047 = vmatpush1.bf16.msra.mxu1 %v3839_v38  ;;  %v3937_v37 = vld [vmem:[#allocation8 + $0x30c] ss:$24 sps:$4 sm:$0xff]   ;;  %v2303_v38 = vld [vmem:[%s4622_s2 + $0x8] sm:$0xff] }
  0xa5   :  { %2048 = vmatprep.subr.bf16.mxu1 %v3847_v39  ;;  %v3932_v39 = vld [vmem:[#allocation8 + $0x638] ss:$24 sps:$4 sm:$0xff]  }
  0xa7   :  { %2006 = vmatpush2.bf16.msra.mxu0 %v3842_v40  ;;  %v3940_v40 = vld [vmem:[#allocation8 + $0x60c] ss:$24 sps:$4 sm:$0xff]  }
  0xa8   :  { %2007 = vmatprep.subr.bf16.mxu0 %v3850_v41  ;;  %2049 = vmatpush2.bf16.msra.mxu1 %v3845_v42  ;;  %v3935_v41 = vld [vmem:[#allocation8 + $0x308] ss:$24 sps:$4 sm:$0xff]   ;;  %v3943_v42 = vld [vmem:[#allocation8 + $0x5dc] ss:$24 sps:$4 sm:$0xff]  }
  0xa9   :  { %2050 = vmatprep.subr.bf16.mxu1 %v3853_v43  ;;  %v3938_v43 = vld [vmem:[#allocation8 + $0x608] ss:$24 sps:$4 sm:$0xff]  }
  0xab   :  { %2008 = vmatpush2.bf16.msra.mxu0 %v3848_v44  ;;  %v3946_v44 = vld [vmem:[#allocation8 + $0x8dc] ss:$24 sps:$4 sm:$0xff]  }
  0xac   :  { %2009 = vmatprep.subr.bf16.mxu0 %v3856_v45  ;;  %2051 = vmatpush2.bf16.msra.mxu1 %v3851_v46  ;;  %v3941_v45 = vld [vmem:[#allocation8 + $0x5d8] ss:$24 sps:$4 sm:$0xff]   ;;  %v3949_v46 = vld [vmem:[#allocation8 + $0x5ac] ss:$24 sps:$4 sm:$0xff]  }
  0xad   :  { %2052 = vmatprep.subr.bf16.mxu1 %v3859_v47  ;;  %v3944_v47 = vld [vmem:[#allocation8 + $0x8d8] ss:$24 sps:$4 sm:$0xff]  }
  0xaf   :  { %2010 = vmatpush2.bf16.msra.mxu0 %v3854_v48  ;;  %v3952_v48 = vld [vmem:[#allocation8 + $0x8ac] ss:$24 sps:$4 sm:$0xff]  }
  0xb0   :  { %2011 = vmatprep.subr.bf16.mxu0 %v3862_v49  ;;  %2053 = vmatpush2.bf16.msra.mxu1 %v3857_v50  ;;  %v3947_v49 = vld [vmem:[#allocation8 + $0x5a8] ss:$24 sps:$4 sm:$0xff]   ;;  %v3955_v50 = vld [vmem:[#allocation8 + $0x57c] ss:$24 sps:$4 sm:$0xff]  }
  0xb1   :  { %2054 = vmatprep.subr.bf16.mxu1 %v3865_v52  ;;  %v3950_v52 = vld [vmem:[#allocation8 + $0x8a8] ss:$24 sps:$4 sm:$0xff]  }
  0xb3   :  { %2012 = vmatpush2.bf16.msra.mxu0 %v3860_v53  ;;  %v3958_v53 = vld [vmem:[#allocation8 + $0x87c] ss:$24 sps:$4 sm:$0xff]  }
  0xb4   :  { %2013 = vmatprep.subr.bf16.mxu0 %v3868_v54  ;;  %2055 = vmatpush2.bf16.msra.mxu1 %v3863_v55  ;;  %v3953_v54 = vld [vmem:[#allocation8 + $0x578] ss:$24 sps:$4 sm:$0xff]   ;;  %v3961_v55 = vld [vmem:[#allocation8 + $0x54c] ss:$24 sps:$4 sm:$0xff]  }
  0xb5   :  { %2056 = vmatprep.subr.bf16.mxu1 %v3871_v56  ;;  %v3956_v56 = vld [vmem:[#allocation8 + $0x878] ss:$24 sps:$4 sm:$0xff]  }
  0xb7   :  { %2014 = vmatpush2.bf16.msra.mxu0 %v3866_v57  ;;  %v3964_v57 = vld [vmem:[#allocation8 + $0x84c] ss:$24 sps:$4 sm:$0xff]  }
  0xb8   :  { %2015 = vmatprep.subr.bf16.mxu0 %v3874_v58  ;;  %2057 = vmatpush2.bf16.msra.mxu1 %v3869_v59  ;;  %v3959_v58 = vld [vmem:[#allocation8 + $0x548] ss:$24 sps:$4 sm:$0xff]   ;;  %v3967_v59 = vld [vmem:[#allocation8 + $0x51c] ss:$24 sps:$4 sm:$0xff]  }
  0xb9   :  { %2058 = vmatprep.subr.bf16.mxu1 %v3877_v60  ;;  %v3962_v60 = vld [vmem:[#allocation8 + $0x848] ss:$24 sps:$4 sm:$0xff]  }
  0xbb   :  { %2016 = vmatpush2.bf16.msra.mxu0 %v3872_v61  ;;  %v3970_v61 = vld [vmem:[#allocation8 + $0x81c] ss:$24 sps:$4 sm:$0xff]  }
  0xbc   :  { %2017 = vmatprep.subr.bf16.mxu0 %v3880_v62  ;;  %2059 = vmatpush2.bf16.msra.mxu1 %v3875_v63  ;;  %v3965_v62 = vld [vmem:[#allocation8 + $0x518] ss:$24 sps:$4 sm:$0xff]   ;;  %v3973_v63 = vld [vmem:[#allocation8 + $0x4ec] ss:$24 sps:$4 sm:$0xff]  }
  0xbd   :  { %2060 = vmatprep.subr.bf16.mxu1 %v3883_v0  ;;  %v3968_v0 = vld [vmem:[#allocation8 + $0x818] ss:$24 sps:$4 sm:$0xff]  }
  0xbf   :  { %2018 = vmatpush2.bf16.msra.mxu0 %v3878_v1  ;;  %v3976_v1 = vld [vmem:[#allocation8 + $0x7ec] ss:$24 sps:$4 sm:$0xff]  }
  0xc0   :  { %2019 = vmatprep.subr.bf16.mxu0 %v3886_v2  ;;  %2061 = vmatpush2.bf16.msra.mxu1 %v3881_v4  ;;  %v3971_v2 = vld [vmem:[#allocation8 + $0x4e8] ss:$24 sps:$4 sm:$0xff]   ;;  %v3979_v4 = vld [vmem:[#allocation8 + $0x4bc] ss:$24 sps:$4 sm:$0xff]  }
  0xc1   :  { %2062 = vmatprep.subr.bf16.mxu1 %v3889_v5  ;;  %v3974_v5 = vld [vmem:[#allocation8 + $0x7e8] ss:$24 sps:$4 sm:$0xff]  }
  0xc3   :  { %2020 = vmatpush2.bf16.msra.mxu0 %v3884_v7  ;;  %v3982_v7 = vld [vmem:[#allocation8 + $0x7bc] ss:$24 sps:$4 sm:$0xff]  }
  0xc4   :  { %2075 = vmatprep.subr.bf16.mxu0 %v3895_v8  ;;  %2063 = vmatpush2.bf16.msra.mxu1 %v3887_v9  ;;  %v3977_v8 = vld [vmem:[#allocation8 + $0x4b8] ss:$24 sps:$4 sm:$0xff]   ;;  %v3985_v9 = vld [vmem:[#allocation8 + $0x48c] ss:$24 sps:$4 sm:$0xff]  }
  0xc5   :  { %2118 = vmatprep.subr.bf16.mxu1 %v3898_v11  ;;  %v3980_v11 = vld [vmem:[#allocation8 + $0x7b8] ss:$24 sps:$4 sm:$0xff]  }
  0xc6   :  { %2022 = vmatmul.mubr.bf16.vlgmr.msra.gmra.mxu0 %v4454_v10 }
  0xc7   :  { %2076 = vmatpush1.bf16.msra.mxu0 %v3893_v12  ;;  %2107 = vmatprep.mubr.bf16.mxu0 %v4441_v51  ;;  %v3911_v51 = vld [vmem:[#allocation8 + $0x3c8] ss:$24 sps:$4 sm:$0xff]   ;;  %v3988_v12 = vld [vmem:[#allocation8 + $0x78c] ss:$24 sps:$4 sm:$0xff]  }
  0xc8   :  { %2065 = vmatmul.mubr.bf16.vlgmr.msra.gmra.mxu1 %v4444_v3  ;;  %2077 = vmatprep.subr.bf16.mxu0 %v3901_v13  ;;  %v3919_v3 = vld [vmem:[#allocation8 + $0x39c] ss:$24 sps:$4 sm:$0xff]   ;;  %v3983_v13 = vld [vmem:[#allocation8 + $0x488] ss:$24 sps:$4 sm:$0xff]  }
  0xc9   :  { %2119 = vmatpush1.bf16.msra.mxu1 %v3896_v14  ;;  %2150 = vmatprep.mubr.bf16.mxu1 %v4450_v33  ;;  %v2302_v33 = vld [vmem:[%s4622_s2] sm:$0xff]  ;;  %v3991_v14 = vld [vmem:[#allocation8 + $0x164] ss:$24 sps:$4 sm:$0xff]  }
  0xca   :  { %2120 = vmatprep.subr.bf16.mxu1 %v3904_v15  ;;  %2307 = vperm.xlu0 %3691, %v2302_v33   ;;  %v3986_v15 = vld [vmem:[#allocation8 + $0x788] ss:$24 sps:$4 sm:$0xff]  }
  0xcb   :  { %2078 = vmatpush1.bf16.msra.mxu0 %v3899_v16  ;;  %v3994_v16 = vld [vmem:[#allocation8 + $0x464] ss:$24 sps:$4 sm:$0xff]   ;;  %v4016_v33 = vld [vmem:[#allocation8 + $0x3a0] ss:$24 sps:$4 sm:$0xff]  }
  0xcc   :  { %2079 = vmatprep.subr.bf16.mxu0 %v3907_v17  ;;  %v3989_v17 = vld [vmem:[#allocation8 + $0x160] ss:$24 sps:$4 sm:$0xff]  }
  0xcd   :  { %2121 = vmatpush1.bf16.msra.mxu1 %v3902_v18  ;;  %v3997_v18 = vld [vmem:[#allocation8 + $0x134] ss:$24 sps:$4 sm:$0xff]  }
  0xce   :  { %2122 = vmatprep.subr.bf16.mxu1 %v3910_v19  ;;  %2310 = vperm.xlu0 %3691, %v2303_v38   ;;  %v3992_v19 = vld [vmem:[#allocation8 + $0x460] ss:$24 sps:$4 sm:$0xff]   ;;  %v4022_v38 = vld [vmem:[#allocation8 + $0x370] ss:$24 sps:$4 sm:$0xff]  }
  0xcf   :  { %2080 = vmatpush1.bf16.msra.mxu0 %v3905_v20  ;;  %v4000_v20 = vld [vmem:[#allocation8 + $0x434] ss:$24 sps:$4 sm:$0xff]  }
  0xd0   :  { %2081 = vmatprep.subr.bf16.mxu0 %v3913_v21  ;;  %v3995_v21 = vld [vmem:[#allocation8 + $0x130] ss:$24 sps:$4 sm:$0xff]  }
  0xd1   :  { %2123 = vmatpush1.bf16.msra.mxu1 %v3908_v22  ;;  %v3998_v22 = vld [vmem:[#allocation8 + $0x430] ss:$24 sps:$4 sm:$0xff]  }
  0xd2   :  { %2124 = vmatprep.subr.bf16.mxu1 %v3916_v23  ;;  %v4213_v23 = vld [vmem:[#allocation7 + $0x4] ss:$24 sps:$4 sm:$0xff]  }
  0xd3   :  { %2082 = vmatpush1.bf16.msra.mxu0 %v3911_v51  ;;  %v4003_v51 = vld [vmem:[#allocation8 + $0x104] ss:$24 sps:$4 sm:$0xff]  }
  0xd4   :  { %2083 = vmatprep.subr.bf16.mxu0 %v3919_v3  ;;  %v4006_v3 = vld [vmem:[#allocation8 + $0x404] ss:$24 sps:$4 sm:$0xff]  }
  0xd5   :  { %2125 = vmatpush1.bf16.msra.mxu1 %v3914_v24  ;;  %v4001_v24 = vld [vmem:[#allocation8 + $0x100] ss:$24 sps:$4 sm:$0xff]  }
  0xd6   :  { %2126 = vmatprep.subr.bf16.mxu1 %v3922_v25  ;;  %v4214_v25 = vld [vmem:[#allocation7 + $0xc] ss:$24 sps:$4 sm:$0xff]  }
  0xd7   :  { %2084 = vmatpush1.bf16.msra.mxu0 %v3917_v26  ;;  %v4009_v26 = vld [vmem:[#allocation8 + $0xd4] ss:$24 sps:$4 sm:$0xff]  }
  0xd8   :  { %2085 = vmatprep.subr.bf16.mxu0 %v3925_v27  ;;  %v4012_v27 = vld [vmem:[#allocation8 + $0x3d4] ss:$24 sps:$4 sm:$0xff]  }
  0xd9   :  { %2127 = vmatpush1.bf16.msra.mxu1 %v3920_v28  ;;  %v4007_v28 = vld [vmem:[#allocation8 + $0xd0] ss:$24 sps:$4 sm:$0xff]  }
  0xda   :  { %2128 = vmatprep.subr.bf16.mxu1 %v3928_v29  ;;  %v4010_v29 = vld [vmem:[#allocation8 + $0x3d0] ss:$24 sps:$4 sm:$0xff]  }
  0xdb   :  { %2086 = vmatpush1.bf16.msra.mxu0 %v3923_v30  ;;  %v4015_v30 = vld [vmem:[#allocation8 + $0xa4] ss:$24 sps:$4 sm:$0xff]  }
  0xdc   :  { %2087 = vmatprep.subr.bf16.mxu0 %v3931_v31  ;;  %v4013_v31 = vld [vmem:[#allocation8 + $0xa0] ss:$24 sps:$4 sm:$0xff]  }
  0xdd   :  { %2129 = vmatpush1.bf16.msra.mxu1 %v3926_v32  ;;  %v4021_v32 = vld [vmem:[#allocation8 + $0x74] ss:$24 sps:$4 sm:$0xff]  }
  0xde   :  { %2130 = vmatprep.subr.bf16.mxu1 %v3934_v34  ;;  %v4024_v34 = vld [vmem:[#allocation8 + $0x374] ss:$24 sps:$4 sm:$0xff]  }
  0xdf   :  { %2088 = vmatpush1.bf16.msra.mxu0 %v3929_v36  ;;  %v4019_v36 = vld [vmem:[#allocation8 + $0x70] ss:$24 sps:$4 sm:$0xff]  }
  0xe0   :  { %2089 = vmatprep.subr.bf16.mxu0 %v3937_v37  ;;  %v4027_v37 = vld [vmem:[#allocation8 + $0x44] ss:$24 sps:$4 sm:$0xff]  }
  0xe1   :  { %2131 = vmatpush1.bf16.msra.mxu1 %v3932_v39  ;;  %v4030_v39 = vld [vmem:[#allocation8 + $0x344] ss:$24 sps:$4 sm:$0xff]  }
  0xe2   :  { %2132 = vmatprep.subr.bf16.mxu1 %v3940_v40  ;;  %v4025_v40 = vld [vmem:[#allocation8 + $0x40] ss:$24 sps:$4 sm:$0xff]  }
  0xe3   :  { %2090 = vmatpush1.bf16.msra.mxu0 %v3935_v41  ;;  %v4033_v41 = vld [vmem:[#allocation8 + $0x14] ss:$24 sps:$4 sm:$0xff]  }
  0xe4   :  { %2091 = vmatprep.subr.bf16.mxu0 %v3943_v42  ;;  %v4028_v42 = vld [vmem:[#allocation8 + $0x340] ss:$24 sps:$4 sm:$0xff]  }
  0xe5   :  { %2133 = vmatpush1.bf16.msra.mxu1 %v3938_v43  ;;  %v4036_v43 = vld [vmem:[#allocation8 + $0x314] ss:$24 sps:$4 sm:$0xff]  }
  0xe6   :  { %2134 = vmatprep.subr.bf16.mxu1 %v3946_v44  ;;  %v4031_v44 = vld [vmem:[#allocation8 + $0x10] ss:$24 sps:$4 sm:$0xff]  }
  0xe7   :  { %2092 = vmatpush2.bf16.msra.mxu0 %v3941_v45  ;;  %v4039_v45 = vld [vmem:[#allocation8 + $0x2e4] ss:$24 sps:$4 sm:$0xff]  }
  0xe8   :  { %2093 = vmatprep.subr.bf16.mxu0 %v3949_v46  ;;  %v4034_v46 = vld [vmem:[#allocation8 + $0x310] ss:$24 sps:$4 sm:$0xff]  }
  0xe9   :  { %2135 = vmatpush2.bf16.msra.mxu1 %v3944_v47  ;;  %v4042_v47 = vld [vmem:[#allocation8 + $0x5e4] ss:$24 sps:$4 sm:$0xff]  }
  0xea   :  { %2136 = vmatprep.subr.bf16.mxu1 %v3952_v48  ;;  %v4037_v48 = vld [vmem:[#allocation8 + $0x2e0] ss:$24 sps:$4 sm:$0xff]  }
  0xeb   :  { %2094 = vmatpush2.bf16.msra.mxu0 %v3947_v49  ;;  %v4040_v49 = vld [vmem:[#allocation8 + $0x5e0] ss:$24 sps:$4 sm:$0xff]  }
  0xec   :  { %2095 = vmatprep.subr.bf16.mxu0 %v3955_v50  ;;  %v4045_v50 = vld [vmem:[#allocation8 + $0x2b4] ss:$24 sps:$4 sm:$0xff]  }
  0xed   :  { %2137 = vmatpush2.bf16.msra.mxu1 %v3950_v52  ;;  %v4048_v52 = vld [vmem:[#allocation8 + $0x5b4] ss:$24 sps:$4 sm:$0xff]  }
  0xee   :  { %2138 = vmatprep.subr.bf16.mxu1 %v3958_v53  ;;  %v4043_v53 = vld [vmem:[#allocation8 + $0x2b0] ss:$24 sps:$4 sm:$0xff]  }
  0xef   :  { %2096 = vmatpush2.bf16.msra.mxu0 %v3953_v54  ;;  %v4051_v54 = vld [vmem:[#allocation8 + $0x284] ss:$24 sps:$4 sm:$0xff]  }
  0xf0   :  { %2097 = vmatprep.subr.bf16.mxu0 %v3961_v55  ;;  %v4046_v55 = vld [vmem:[#allocation8 + $0x5b0] ss:$24 sps:$4 sm:$0xff]  }
  0xf1   :  { %2139 = vmatpush2.bf16.msra.mxu1 %v3956_v56  ;;  %v4054_v56 = vld [vmem:[#allocation8 + $0x584] ss:$24 sps:$4 sm:$0xff]  }
  0xf2   :  { %2140 = vmatprep.subr.bf16.mxu1 %v3964_v57  ;;  %v4049_v57 = vld [vmem:[#allocation8 + $0x280] ss:$24 sps:$4 sm:$0xff]  }
  0xf3   :  { %2098 = vmatpush2.bf16.msra.mxu0 %v3959_v58  ;;  %v4057_v58 = vld [vmem:[#allocation8 + $0x254] ss:$24 sps:$4 sm:$0xff]  }
  0xf4   :  { %2099 = vmatprep.subr.bf16.mxu0 %v3967_v59  ;;  %v4052_v59 = vld [vmem:[#allocation8 + $0x580] ss:$24 sps:$4 sm:$0xff]  }
  0xf5   :  { %2141 = vmatpush2.bf16.msra.mxu1 %v3962_v60  ;;  %v4060_v60 = vld [vmem:[#allocation8 + $0x554] ss:$24 sps:$4 sm:$0xff]  }
  0xf6   :  { %2142 = vmatprep.subr.bf16.mxu1 %v3970_v61  ;;  %v4055_v61 = vld [vmem:[#allocation8 + $0x250] ss:$24 sps:$4 sm:$0xff]  }
  0xf7   :  { %2100 = vmatpush2.bf16.msra.mxu0 %v3965_v62  ;;  %v4063_v62 = vld [vmem:[#allocation8 + $0x224] ss:$24 sps:$4 sm:$0xff]  }
  0xf8   :  { %2101 = vmatprep.subr.bf16.mxu0 %v3973_v63  ;;  %v4058_v63 = vld [vmem:[#allocation8 + $0x550] ss:$24 sps:$4 sm:$0xff]  }
  0xf9   :  { %2143 = vmatpush2.bf16.msra.mxu1 %v3968_v0  ;;  %v4066_v0 = vld [vmem:[#allocation8 + $0x524] ss:$24 sps:$4 sm:$0xff]  }
  0xfa   :  { %2144 = vmatprep.subr.bf16.mxu1 %v3976_v1  ;;  %v4061_v1 = vld [vmem:[#allocation8 + $0x220] ss:$24 sps:$4 sm:$0xff]  }
  0xfb   :  { %2102 = vmatpush2.bf16.msra.mxu0 %v3971_v2  ;;  %v4069_v2 = vld [vmem:[#allocation8 + $0x1f4] ss:$24 sps:$4 sm:$0xff]  }
  0xfc   :  { %2103 = vmatprep.subr.bf16.mxu0 %v3979_v4  ;;  %v4064_v4 = vld [vmem:[#allocation8 + $0x520] ss:$24 sps:$4 sm:$0xff]  }
  0xfd   :  { %2145 = vmatpush2.bf16.msra.mxu1 %v3974_v5  ;;  %v4072_v5 = vld [vmem:[#allocation8 + $0x4f4] ss:$24 sps:$4 sm:$0xff]  }
  0xfe   :  { %2146 = vmatprep.subr.bf16.mxu1 %v3982_v7  ;;  %v4067_v7 = vld [vmem:[#allocation8 + $0x1f0] ss:$24 sps:$4 sm:$0xff]  }
  0xff   :  { %2104 = vmatpush2.bf16.msra.mxu0 %v3977_v8  ;;  %v4075_v8 = vld [vmem:[#allocation8 + $0x1c4] ss:$24 sps:$4 sm:$0xff]  }
 0x100   :  { %2105 = vmatprep.subr.bf16.mxu0 %v3985_v9  ;;  %v4070_v9 = vld [vmem:[#allocation8 + $0x4f0] ss:$24 sps:$4 sm:$0xff]  }
 0x101   :  { %2147 = vmatpush2.bf16.msra.mxu1 %v3980_v11  ;;  %v4078_v11 = vld [vmem:[#allocation8 + $0x4c4] ss:$24 sps:$4 sm:$0xff]  }
 0x102   :  { %2148 = vmatprep.subr.bf16.mxu1 %v3988_v12  ;;  %v4073_v12 = vld [vmem:[#allocation8 + $0x1c0] ss:$24 sps:$4 sm:$0xff]  }
 0x103   :  { %2106 = vmatpush2.bf16.msra.mxu0 %v3983_v13  ;;  %v4081_v13 = vld [vmem:[#allocation8 + $0x194] ss:$24 sps:$4 sm:$0xff]  }
 0x104   :  { %2161 = vmatprep.subr.bf16.mxu0 %v3991_v14  ;;  %v4076_v14 = vld [vmem:[#allocation8 + $0x4c0] ss:$24 sps:$4 sm:$0xff]  }
 0x105   :  { %2149 = vmatpush2.bf16.msra.mxu1 %v3986_v15  ;;  %v4084_v15 = vld [vmem:[#allocation8 + $0x494] ss:$24 sps:$4 sm:$0xff]  }
 0x106   :  { %2108 = vmatmul.mubr.bf16.vlgmr.msra.gmra.mxu0 %v4446_v6  ;;  %2204 = vmatprep.subr.bf16.mxu1 %v3994_v16  ;;  %v4004_v6 = vld [vmem:[#allocation8 + $0x400] ss:$24 sps:$4 sm:$0xff]   ;;  %v4079_v16 = vld [vmem:[#allocation8 + $0x190] ss:$24 sps:$4 sm:$0xff]  }
 0x107   :  { %2162 = vmatpush1.bf16.msra.mxu0 %v3989_v17  ;;  %2193 = vmatprep.mubr.bf16.mxu0 %v4213_v23  ;;  %v4087_v17 = vld [vmem:[#allocation8 + $0x764] ss:$24 sps:$4 sm:$0xff]  }
 0x108   :  { %2151 = vmatmul.mubr.bf16.vlgmr.msra.gmra.mxu1 %v4454_v10  ;;  %2163 = vmatprep.subr.bf16.mxu0 %v3997_v18  ;;  %v4018_v10 = vld [vmem:[#allocation8 + $0x3a4] ss:$24 sps:$4 sm:$0xff]   ;;  %v4082_v18 = vld [vmem:[#allocation8 + $0x490] ss:$24 sps:$4 sm:$0xff]  }
 0x109   :  { %2205 = vmatpush1.bf16.msra.mxu1 %v3992_v19  ;;  %2236 = vmatprep.mubr.bf16.mxu1 %v4214_v25  ;;  %v4085_v19 = vld [vmem:[#allocation8 + $0x760] ss:$24 sps:$4 sm:$0xff]   ;;  %v4216_v23 = vld [vmem:[#allocation7 + $0x14] ss:$24 sps:$4 sm:$0xff]   ;;  %v4096_v25 = vld [vmem:[#allocation8 + $0x6d4] ss:$24 sps:$4 sm:$0xff]  }
 0x10a   :  { %2206 = vmatprep.subr.bf16.mxu1 %v4000_v20  ;;  %v4090_v20 = vld [vmem:[#allocation8 + $0x734] ss:$24 sps:$4 sm:$0xff]  }
 0x10b   :  { %2164 = vmatpush1.bf16.msra.mxu0 %v3995_v21  ;;  %v4215_v21 = vld [vmem:[#allocation7] ss:$24 sps:$4 sm:$0xff]  }
 0x10c   :  { %2165 = vmatprep.subr.bf16.mxu0 %v4003_v51  ;;  %v4217_v51 = vld [vmem:[#allocation7 + $0x8] ss:$24 sps:$4 sm:$0xff]  }
 0x10d   :  { %2207 = vmatpush1.bf16.msra.mxu1 %v3998_v22  ;;  %v4088_v22 = vld [vmem:[#allocation8 + $0x730] ss:$24 sps:$4 sm:$0xff]  }
 0x10e   :  { %2208 = vmatprep.subr.bf16.mxu1 %v4006_v3  ;;  %v4093_v3 = vld [vmem:[#allocation8 + $0x704] ss:$24 sps:$4 sm:$0xff]  }
 0x10f   :  { %2166 = vmatpush1.bf16.msra.mxu0 %v4001_v24  ;;  %v4091_v24 = vld [vmem:[#allocation8 + $0x700] ss:$24 sps:$4 sm:$0xff]  }
 0x110   :  { %2167 = vmatprep.subr.bf16.mxu0 %v4009_v26  ;;  %v4094_v26 = vld [vmem:[#allocation8 + $0x6d0] ss:$24 sps:$4 sm:$0xff]  }
 0x111   :  { %2209 = vmatpush1.bf16.msra.mxu1 %v4004_v6  ;;  %v4099_v6 = vld [vmem:[#allocation8 + $0x6a4] ss:$24 sps:$4 sm:$0xff]  }
 0x112   :  { %2210 = vmatprep.subr.bf16.mxu1 %v4012_v27  ;;  %v4097_v27 = vld [vmem:[#allocation8 + $0x6a0] ss:$24 sps:$4 sm:$0xff]  }
 0x113   :  { %2168 = vmatpush1.bf16.msra.mxu0 %v4007_v28  ;;  %v4102_v28 = vld [vmem:[#allocation8 + $0x674] ss:$24 sps:$4 sm:$0xff]  }
 0x114   :  { %2169 = vmatprep.subr.bf16.mxu0 %v4015_v30  ;;  %v4105_v30 = vld [vmem:[#allocation8 + $0x644] ss:$24 sps:$4 sm:$0xff]  }
 0x115   :  { %2211 = vmatpush1.bf16.msra.mxu1 %v4010_v29  ;;  %v4100_v29 = vld [vmem:[#allocation8 + $0x670] ss:$24 sps:$4 sm:$0xff]  }
 0x116   :  { %2212 = vmatprep.subr.bf16.mxu1 %v4018_v10  ;;  %v4103_v10 = vld [vmem:[#allocation8 + $0x640] ss:$24 sps:$4 sm:$0xff]  }
 0x117   :  { %2170 = vmatpush1.bf16.msra.mxu0 %v4013_v31  ;;  %v4108_v31 = vld [vmem:[#allocation8 + $0x614] ss:$24 sps:$4 sm:$0xff]  }
 0x118   :  { %2171 = vmatprep.subr.bf16.mxu0 %v4021_v32  ;;  %v4106_v32 = vld [vmem:[#allocation8 + $0x610] ss:$24 sps:$4 sm:$0xff]  }
 0x119   :  { %2213 = vmatpush1.bf16.msra.mxu1 %v4016_v33  ;;  %v4111_v33 = vld [vmem:[#allocation8 + $0x8e4] ss:$24 sps:$4 sm:$0xff]  }
 0x11a   :  { %2214 = vmatprep.subr.bf16.mxu1 %v4024_v34  ;;  %v4109_v34 = vld [vmem:[#allocation8 + $0x8e0] ss:$24 sps:$4 sm:$0xff]  }
 0x11b   :  { %2172 = vmatpush1.bf16.msra.mxu0 %v4019_v36  ;;  %v4114_v36 = vld [vmem:[#allocation8 + $0x8b4] ss:$24 sps:$4 sm:$0xff]  }
 0x11c   :  { %2173 = vmatprep.subr.bf16.mxu0 %v4027_v37  ;;  %v4112_v37 = vld [vmem:[#allocation8 + $0x8b0] ss:$24 sps:$4 sm:$0xff]  }
 0x11d   :  { %2215 = vmatpush1.bf16.msra.mxu1 %v4022_v38  ;;  %v4117_v38 = vld [vmem:[#allocation8 + $0x884] ss:$24 sps:$4 sm:$0xff]  }
 0x11e   :  { %2216 = vmatprep.subr.bf16.mxu1 %v4030_v39  ;;  %v4115_v39 = vld [vmem:[#allocation8 + $0x880] ss:$24 sps:$4 sm:$0xff]  }
 0x11f   :  { %2174 = vmatpush1.bf16.msra.mxu0 %v4025_v40  ;;  %v4120_v40 = vld [vmem:[#allocation8 + $0x854] ss:$24 sps:$4 sm:$0xff]  }
 0x120   :  { %2175 = vmatprep.subr.bf16.mxu0 %v4033_v41  ;;  %v4118_v41 = vld [vmem:[#allocation8 + $0x850] ss:$24 sps:$4 sm:$0xff]  }
 0x121   :  { %2217 = vmatpush1.bf16.msra.mxu1 %v4028_v42  ;;  %v4123_v42 = vld [vmem:[#allocation8 + $0x824] ss:$24 sps:$4 sm:$0xff]  }
 0x122   :  { %2218 = vmatprep.subr.bf16.mxu1 %v4036_v43  ;;  %v403_v43 = vlaneseq }
 0x123   :  { %2176 = vmatpush1.bf16.msra.mxu0 %v4031_v44  ;;  %v4121_v44 = vld [vmem:[#allocation8 + $0x820] ss:$24 sps:$4 sm:$0xff]  }
 0x124   :  { %2177 = vmatprep.subr.bf16.mxu0 %v4039_v45  ;;  %v4126_v45 = vld [vmem:[#allocation8 + $0x7f4] ss:$24 sps:$4 sm:$0xff]  }
 0x125   :  { %2219 = vmatpush1.bf16.msra.mxu1 %v4034_v46  ;;  %v4469_v46 = vshrl.u32 %v403_v43, 7 }
 0x126   :  { %2220 = vmatprep.subr.bf16.mxu1 %v4042_v47  ;;  %v4124_v47 = vld [vmem:[#allocation8 + $0x7f0] ss:$24 sps:$4 sm:$0xff]  }
 0x127   :  { %2178 = vmatpush2.bf16.msra.mxu0 %v4037_v48 }
 0x128   :  { %2179 = vmatprep.subr.bf16.mxu0 %v4045_v50  ;;  %v409_v50 = vsub.s32 1, %v4469_v46 }
 0x129   :  { %2221 = vmatpush2.bf16.msra.mxu1 %v4040_v49  ;;  %v4129_v49 = vld [vmem:[#allocation8 + $0x7c4] ss:$24 sps:$4 sm:$0xff]  }
 0x12a   :  { %2222 = vmatprep.subr.bf16.mxu1 %v4048_v52  ;;  %v4127_v52 = vld [vmem:[#allocation8 + $0x7c0] ss:$24 sps:$4 sm:$0xff]  }
 0x12b   :  { %2180 = vmatpush2.bf16.msra.mxu0 %v4043_v53  ;;  %v4472_v53 = vld [vmem:[#allocation10] sm:$0x3f] }
 0x12c   :  { %2181 = vmatprep.subr.bf16.mxu0 %v4051_v54 }
 0x12d   :  { %2223 = vmatpush2.bf16.msra.mxu1 %v4046_v55 }
 0x12e   :  { %2224 = vmatprep.subr.bf16.mxu1 %v4054_v56  ;;  %v4132_v56 = vld [vmem:[#allocation8 + $0x794] ss:$24 sps:$4 sm:$0xff]  }
 0x12f   :  { %2182 = vmatpush2.bf16.msra.mxu0 %v4049_v57  ;;  %v405_v57 = vsub.s32 0, %v4469_v46 }
 0x130   :  { %2183 = vmatprep.subr.bf16.mxu0 %v4057_v58  ;;  %v410_v58 = vrot.slane %v4472_v53, %v409_v50 }
 0x131   :  { %2225 = vmatpush2.bf16.msra.mxu1 %v4052_v59  ;;  %v4130_v59 = vld [vmem:[#allocation8 + $0x790] ss:$24 sps:$4 sm:$0xff]  }
 0x132   :  { %2226 = vmatprep.subr.bf16.mxu1 %v4060_v60 }
 0x133   :  { %2184 = vmatpush2.bf16.msra.mxu0 %v4055_v61 }
 0x134   :  { %2185 = vmatprep.subr.bf16.mxu0 %v4063_v62  ;;  %v406_v62 = vrot.slane %v4472_v53, %v405_v57 }
 0x135   :  { %2227 = vmatpush2.bf16.msra.mxu1 %v4058_v63 }
 0x136   :  { %2228 = vmatprep.subr.bf16.mxu1 %v4066_v0 }
 0x137   :  { %2186 = vmatpush2.bf16.msra.mxu0 %v4061_v1 }
 0x138   :  { %2187 = vmatprep.subr.bf16.mxu0 %v4069_v2 }
 0x139   :  { %2229 = vmatpush2.bf16.msra.mxu1 %v4064_v4 }
 0x13a   :  { %2230 = vmatprep.subr.bf16.mxu1 %v4072_v5 }
 0x13b   :  { %2188 = vmatpush2.bf16.msra.mxu0 %v4067_v7  ;;  %v4218_v7 = vld [vmem:[#allocation7 + $0x10] ss:$24 sps:$4 sm:$0xff]  }
 0x13c   :  { %2189 = vmatprep.subr.bf16.mxu0 %v4075_v8 }
 0x13d   :  { %2231 = vmatpush2.bf16.msra.mxu1 %v4070_v9 }
 0x13e   :  { %2232 = vmatprep.subr.bf16.mxu1 %v4078_v11 }
 0x13f   :  { %2190 = vmatpush2.bf16.msra.mxu0 %v4073_v12 }
 0x140   :  { %2191 = vmatprep.subr.bf16.mxu0 %v4081_v13 }
 0x141   :  { %2233 = vmatpush2.bf16.msra.mxu1 %v4076_v14 }
 0x142   :  { %2234 = vmatprep.subr.bf16.mxu1 %v4084_v15 }
 0x143   :  { %2192 = vmatpush2.bf16.msra.mxu0 %v4079_v16 }
 0x144   :  { %2247 = vmatprep.subr.bf16.mxu0 %v4087_v17 }
 0x145   :  { %2235 = vmatpush2.bf16.msra.mxu1 %v4082_v18 }
 0x146   :  { %2194 = vmatmul.mubr.bf16.vlgmr.msra.gmra.mxu0 %v4215_v21  ;;  %v1937_v48 = vpop.f32.mrf.mxu0 }
 0x147   :  { %2248 = vmatpush1.bf16.msra.mxu0 %v4085_v19  ;;  %2279 = vmatprep.mubr.bf16.mxu0 %v4216_v23  ;;  %v1980_v55 = vpop.f32.mrf.mxu1  ;;  %v1938_v4 = vadd.f32 %v1937_v48, %v406_v62  ;;  %v4477_v23 = vand.u32 127, %v403_v43 }
 0x148   :  { %2237 = vmatmul.mubr.bf16.vlgmr.msra.gmra.mxu1 %v4217_v51  ;;  %2249 = vmatprep.subr.bf16.mxu0 %v4090_v20  ;;  %v1939_v54 = vpop.f32.mrf.mxu0 }
 0x149   :  { %2359 = vmatprep.mubr.bf16.mxu1 %v4367_v35  ;;  %v1982_v61 = vpop.f32.mrf.mxu1  ;;  %v1940_v63 = vadd.f32 %v1939_v54, %v410_v58  ;;  %v1981_v15 = vadd.f32 %v1980_v55, %v1938_v4 }
 0x14a   :  { %v1941_v60 = vpop.f32.mrf.mxu0 }
 0x14b   :  { %2250 = vmatpush1.bf16.msra.mxu0 %v4088_v22  ;;  %v1984_v1 = vpop.f32.mrf.mxu1  ;;  %v1942_v2 = vadd.f32 %v1941_v60, %v406_v62  ;;  %v1983_v8 = vadd.f32 %v1982_v61, %v1940_v63  ;;  %v2308_v22 = vpop.permute.xlu0 %2307 }
 0x14c   :  { %2251 = vmatprep.subr.bf16.mxu0 %v4093_v3  ;;  %v1943_v0 = vpop.f32.mrf.mxu0  ;;  %vm2312_vm0 = vcmp.eq.s32.totalorder %v2308_v22, %v4477_v23  ;;  %v4170_v22 = vld [vmem:[#allocation11 + $0x128] sm:$0xff]  }
 0x14d   :  { %v1944_v9 = vadd.f32 %v1943_v0, %v410_v58  ;;  %v1986_v11 = vpop.f32.mrf.mxu1  ;;  %v1985_v13 = vadd.f32 %v1984_v1, %v1942_v2 }
 0x14f   :  { %2252 = vmatpush1.bf16.msra.mxu0 %v4091_v24  ;;  %v1987_v17 = vadd.f32 %v1986_v11, %v1944_v9  ;;  %v2311_v51 = vpop.permute.xlu0 %2310  ;;  %v4520_v9 = vmul.u32 768, %v4469_v46 }
 0x150   :  { %2253 = vmatprep.subr.bf16.mxu0 %v4096_v25  ;;  %vm2313_vm1 = vcmp.eq.s32.totalorder %v2311_v51, %v4477_v23  ;;  %v425_v51 = vsub.s32 5, %v4469_v46 }
 0x153   :  { %2254 = vmatpush1.bf16.msra.mxu0 %v4094_v26  ;;  %v4368_v26 = vmov 0.0  }
 0x154   :  { %2255 = vmatprep.subr.bf16.mxu0 %v4099_v6  ;;  %v2314_v6 = vsel %vm2312_vm0, 1.0, %v4368_v26 }
 0x157   :  { %2256 = vmatpush1.bf16.msra.mxu0 %v4097_v27  ;;  %v2315_v27 = vsel %vm2313_vm1, 1.0, %v4368_v26  ;;  %v4171_v26 = vld [vmem:[#allocation11 + $0x160] sm:$0xff]  }
 0x158   :  { %2257 = vmatprep.subr.bf16.mxu0 %v4102_v28 }
 0x15b   :  { %2258 = vmatpush1.bf16.msra.mxu0 %v4100_v29 }
 0x15c   :  { %2259 = vmatprep.subr.bf16.mxu0 %v4105_v30 }
 0x15f   :  { %2260 = vmatpush1.bf16.msra.mxu0 %v4103_v10  ;;  %v4493_v10 = vpack.c.bf16 %v2315_v27, %v2314_v6 }
 0x160   :  { %2261 = vmatprep.subr.bf16.mxu0 %v4108_v31 }
 0x163   :  { %2262 = vmatpush1.bf16.msra.mxu0 %v4106_v32 }
 0x164   :  { %2263 = vmatprep.subr.bf16.mxu0 %v4111_v33  ;;  %v417_v33 = vsub.s32 3, %v4469_v46 }
 0x167   :  { %2264 = vmatpush2.bf16.msra.mxu0 %v4109_v34  ;;  %v413_v34 = vsub.s32 2, %v4469_v46 }
 0x168   :  { %2265 = vmatprep.subr.bf16.mxu0 %v4114_v36 }
 0x16b   :  { %2266 = vmatpush2.bf16.msra.mxu0 %v4112_v37  ;;  %v418_v37 = vrot.slane %v4472_v53, %v417_v33  ;;  %v426_v33 = vrot.slane %v4472_v53, %v425_v51 }
 0x16c   :  { %2267 = vmatprep.subr.bf16.mxu0 %v4117_v38  ;;  %v414_v38 = vrot.slane %v4472_v53, %v413_v34  ;;  %v4173_v34 = vld [vmem:[#allocation11 + $0x158] sm:$0xff]  }
 0x16f   :  { %2268 = vmatpush2.bf16.msra.mxu0 %v4115_v39 }
 0x170   :  { %2269 = vmatprep.subr.bf16.mxu0 %v4120_v40 }
 0x173   :  { %2270 = vmatpush2.bf16.msra.mxu0 %v4118_v41 }
 0x174   :  { %2271 = vmatprep.subr.bf16.mxu0 %v4123_v42 }
 0x177   :  { %2272 = vmatpush2.bf16.msra.mxu0 %v4121_v44 }
 0x178   :  { %2273 = vmatprep.subr.bf16.mxu0 %v4126_v45 }
 0x17b   :  { %2274 = vmatpush2.bf16.msra.mxu0 %v4124_v47 }
 0x17c   :  { %2275 = vmatprep.subr.bf16.mxu0 %v4129_v49 }
 0x17f   :  { %2276 = vmatpush2.bf16.msra.mxu0 %v4127_v52 }
 0x180   :  { %2277 = vmatprep.subr.bf16.mxu0 %v4132_v56 }
 0x183   :  { %2278 = vmatpush2.bf16.msra.mxu0 %v4130_v59 }
 0x186   :  { %v2023_v5 = vpop.f32.mrf.mxu0  ;;  %2280 = vmatmul.mubr.bf16.vlgmr.msra.gmra.mxu0 %v4218_v7  ;;  %v2499_v7 = vadd.s32 8, %v4469_v46 }
 0x187   :  { %v2024_v19 = vadd.f32 %v2023_v5, %v1981_v15 }
 0x188   :  { %v2025_v12 = vpop.f32.mrf.mxu0  ;;  %v2066_v31 = vpop.f32.mrf.mxu1  ;;  %v4525_v11 = vmul.u32 768, %v2499_v7 }
 0x189   :  { %v2026_v14 = vadd.f32 %v2025_v12, %v1983_v8  ;;  %v2067_v41 = vadd.f32 %v2066_v31, %v414_v38  ;;  %v2500_v8 = vadd.s32 128, %v4477_v23  ;;  %v4165_v12 = vld [vmem:[#allocation11 + $0x178] sm:$0xff]  }
 0x18a   :  { %v2027_v16 = vpop.f32.mrf.mxu0  ;;  %v2068_v32 = vpop.f32.mrf.mxu1  ;;  %3654 = vmatprep.subr.bf16.mxu0 %v4165_v12 }
 0x18b   :  { %v2028_v18 = vadd.f32 %v2027_v16, %v1985_v13  ;;  %4181 = vtanh.f32 %v2026_v14  ;;  %v2069_v40 = vadd.f32 %v2068_v32, %v418_v37  ;;  %v4166_v13 = vld [vmem:[#allocation11 + $0x138] sm:$0xff]   ;;  %v4167_v14 = vld [vmem:[#allocation11 + $0x170] sm:$0xff]   ;;  %v2508_v15 = vadd.s32 %v4520_v9, %v2500_v8  ;;  %v4172_v32 = vld [vmem:[#allocation11 + $0x120] sm:$0xff]  }
 0x18c   :  { %v2029_v20 = vpop.f32.mrf.mxu0  ;;  %v2070_v36 = vpop.f32.mrf.mxu1  ;;  %v4528_v16 = vstv %s2519_s15  ;;  %3655 = vmatpush3.bf16.msra.mxu0 %v4166_v13 }
 0x18d   :  { %v2030_v21 = vadd.f32 %v2029_v20, %v1987_v17  ;;  %4183 = vtanh.f32 %v2028_v18  ;;  %v2071_v45 = vadd.f32 %v2070_v36, %v414_v38  ;;  %v4168_v17 = vld [vmem:[#allocation11 + $0x130] sm:$0xff]   ;;  %3656 = vmatprep.subr.bf16.mxu0 %v4167_v14  ;;  %v4169_v18 = vld [vmem:[#allocation11 + $0x168] sm:$0xff]   ;;  %v2522_v20 = vadd.s32 %v4528_v16, %v2508_v15 }
 0x18e   :  { %v2072_v39 = vpop.f32.mrf.mxu1 }
 0x18f   :  { %4185 = vtanh.f32 %v2030_v21  ;;  %v2073_v52 = vadd.f32 %v2072_v39, %v418_v37 }
 0x190   :  { %4187 = vtanh.f32 %v2024_v19  ;;  %3657 = vmatpush3.bf16.msra.mxu0 %v4168_v17 }
 0x191   :  { %3658 = vmatprep.subr.bf16.mxu0 %v4169_v18 }
 0x194   :  { %3659 = vmatpush3.bf16.msra.mxu0 %v4170_v22 }
 0x195   :  { %3660 = vmatprep.subr.bf16.mxu0 %v4171_v26 }
 0x198   :  { %v4481_v3 = vpop.eup %4181  ;;  %3661 = vmatpush3.bf16.msra.mxu0 %v4172_v32 }
 0x199   :  { %3662 = vmatprep.subr.bf16.mxu0 %v4173_v34 }
 0x19a   :  { %v4483_v24 = vpop.eup %4183 }
 0x19c   :  { %v4485_v25 = vpop.eup %4185 }
 0x19d   :  { %v4487_v28 = vpop.eup %4187  ;;  %v2318_v29 = vpack.c.bf16 %v4485_v25, %v4481_v3 }
 0x19e   :  { %v2317_v30 = vpack.c.bf16 %v4483_v24, %v4487_v28 }
 0x19f   :  { %2341 = vmatprep.subr.bf16.mxu1 %v2318_v29  ;;  %v2534_v29 = vshrl.u32 %v2522_v20, 16 }
 0x1a0   :  { %2342 = vmatpush1.bf16.msra.mxu1 %v2317_v30  ;;  %v421_v30 = vsub.s32 4, %v4469_v46 }
 0x1a1   :  { %v2546_v38 = vxor.u32 %v2534_v29, %v2522_v20 }
 0x1a2   :  { %v422_v39 = vrot.slane %v4472_v53, %v421_v30 }
 0x1a3   :  { %3537 = vmatmul.mubr.msk.bf16.vlgmr.msra.gmra.mxu1 %vm2323_vm2, %v4493_v10  ;;  %v2558_v46 = vmul.u32 2146121005, %v2546_v38 }
 0x1a4   :  { %2402 = vmatprep.mubr.bf16.mxu1 %v4367_v35 }
 0x1c6   :  { %v2109_v42 = vpop.f32.mrf.mxu0 }
 0x1c7   :  { %v2110_v48 = vadd.f32 %v2109_v42, %v2067_v41  ;;  %v4174_v41 = vld [vmem:[#allocation11 + $0x118] sm:$0xff]  }
 0x1c8   :  { %v2111_v43 = vpop.f32.mrf.mxu0  ;;  %v2152_v44 = vpop.f32.mrf.mxu1  ;;  %3663 = vmatpush3.bf16.msra.mxu0 %v4174_v41 }
 0x1c9   :  { %v2112_v47 = vadd.f32 %v2111_v43, %v2069_v40  ;;  %v2153_v60 = vadd.f32 %v2152_v44, %v2110_v48 }
 0x1ca   :  { %v2113_v49 = vpop.f32.mrf.mxu0  ;;  %v2154_v50 = vpop.f32.mrf.mxu1 }
 0x1cb   :  { %v2114_v54 = vadd.f32 %v2113_v49, %v2071_v45  ;;  %v2155_v55 = vadd.f32 %v2154_v50, %v2112_v47 }
 0x1cc   :  { %v2115_v56 = vpop.f32.mrf.mxu0  ;;  %v2156_v57 = vpop.f32.mrf.mxu1 }
 0x1cd   :  { %v2116_v58 = vadd.f32 %v2115_v56, %v2073_v52  ;;  %v2157_v59 = vadd.f32 %v2156_v57, %v2114_v54  ;;  %4189 = vtanh.f32 %v2155_v55  ;;  %v2570_v56 = vshrl.u32 %v2558_v46, 15 }
 0x1ce   :  { %v2158_v61 = vpop.f32.mrf.mxu1 }
 0x1cf   :  { %v2159_v62 = vadd.f32 %v2158_v61, %v2116_v58  ;;  %4191 = vtanh.f32 %v2157_v59  ;;  %v2507_v58 = vadd.s32 %v4520_v9, %v4477_v23  ;;  %v2513_v59 = vadd.s32 %v4525_v11, %v4477_v23 }
 0x1d0   :  { %v2582_v12 = vxor.u32 %v2570_v56, %v2558_v46  ;;  %v4137_v56 = vld [vmem:[#allocation11 + $0x68] sm:$0xff]  }
 0x1d1   :  { %4193 = vtanh.f32 %v2159_v62  ;;  %v2521_v14 = vadd.s32 %v4528_v16, %v2507_v58  ;;  %v2527_v15 = vadd.s32 %v4528_v16, %v2513_v59 }
 0x1d2   :  { %4195 = vtanh.f32 %v2153_v60  ;;  %v2594_v17 = vmul.u32 2221713035, %v2582_v12 }
 0x1d3   :  { %v2533_v18 = vshrl.u32 %v2521_v14, 16 }
 0x1d5   :  { %v2545_v22 = vxor.u32 %v2533_v18, %v2521_v14  ;;  %v4139_v14 = vld [vmem:[#allocation11 + $0x60] sm:$0xff]  }
 0x1da   :  { %v4502_v63 = vpop.eup %4189 }
 0x1dc   :  { %v4504_v0 = vpop.eup %4191 }
 0x1de   :  { %v4506_v1 = vpop.eup %4193 }
 0x1df   :  { %v4508_v2 = vpop.eup %4195  ;;  %v2320_v4 = vpack.c.bf16 %v4506_v1, %v4502_v63 }
 0x1e0   :  { %v2319_v5 = vpack.c.bf16 %v4504_v0, %v4508_v2 }
 0x1e1   :  { %2384 = vmatprep.subr.bf16.mxu1 %v2320_v4 }
 0x1e2   :  { %2385 = vmatpush1.bf16.msra.mxu1 %v2319_v5 }
 0x1e5   :  { %3538 = vmatmul.mubr.msk.bf16.vlgmr.msra.gmra.mxu1 %vm2323_vm2, %v4493_v10 }
 0x1e6   :  { %2445 = vmatprep.mubr.bf16.mxu1 %v4367_v35  ;;  %v2514_v35 = vadd.s32 %v4525_v11, %v2500_v8 }
 0x1e8   :  { %v2528_v21 = vadd.s32 %v4528_v16, %v2514_v35 }
 0x1ea   :  { %v2540_v31 = vshrl.u32 %v2528_v21, 16 }
 0x1ec   :  { %v2552_v40 = vxor.u32 %v2540_v31, %v2528_v21  ;;  %v2606_v21 = vshrl.u32 %v2594_v17, 16 }
 0x1ee   :  { %v2564_v49 = vmul.u32 2146121005, %v2552_v40 }
 0x1f0   :  { %v2576_v62 = vshrl.u32 %v2564_v49, 15 }
 0x1f2   :  { %v2588_v35 = vxor.u32 %v2576_v62, %v2564_v49 }
 0x1f4   :  { %v2600_v20 = vmul.u32 2221713035, %v2588_v35 }
 0x1f6   :  { %v2612_v26 = vshrl.u32 %v2600_v20, 16 }
 0x1f8   :  { %v2624_v31 = vxor.u32 %v2612_v26, %v2600_v20  ;;  %v4140_v20 = vld [vmem:[#allocation11 + $0x20] sm:$0xff]   ;;  %v4142_v26 = vld [vmem:[#allocation11 + $0x18] sm:$0xff]  }
 0x206   :  { %v2195_v19 = vpop.f32.mrf.mxu0 }
 0x207   :  { %v2196_v47 = vadd.f32 %v2195_v19, %v422_v39  ;;  %v2539_v19 = vshrl.u32 %v2527_v15, 16 }
 0x208   :  { %v2197_v6 = vpop.f32.mrf.mxu0  ;;  %v2238_v27 = vpop.f32.mrf.mxu1 }
 0x209   :  { %v2198_v42 = vadd.f32 %v2197_v6, %v426_v33  ;;  %v2239_v60 = vadd.f32 %v2238_v27, %v2196_v47  ;;  %v2551_v51 = vxor.u32 %v2539_v19, %v2527_v15  ;;  %v2618_v6 = vxor.u32 %v2606_v21, %v2594_v17  ;;  %v4141_v21 = vld [vmem:[#allocation11 + $0x58] sm:$0xff]  }
 0x20a   :  { %v2199_v36 = vpop.f32.mrf.mxu0  ;;  %v2240_v37 = vpop.f32.mrf.mxu1  ;;  %v2557_v27 = vmul.u32 2146121005, %v2545_v22 }
 0x20b   :  { %v2200_v45 = vadd.f32 %v2199_v36, %v422_v39  ;;  %v2241_v50 = vadd.f32 %v2240_v37, %v2198_v42  ;;  %v2563_v29 = vmul.u32 2146121005, %v2551_v51  ;;  %v4133_v37 = vld [vmem:[#allocation11 + $0x78] sm:$0xff]   ;;  %v2630_v38 = vand.u32 8388607, %v2618_v6  ;;  %v4143_v6 = vld [vmem:[#allocation11 + $0x50] sm:$0xff]  }
 0x20c   :  { %v2201_v43 = vpop.f32.mrf.mxu0  ;;  %v2242_v44 = vpop.f32.mrf.mxu1  ;;  %v2569_v39 = vshrl.u32 %v2557_v27, 15  ;;  %v2636_v42 = vand.u32 8388607, %v2624_v31  ;;  %v2502_v31 = vadd.s32 384, %v4477_v23 }
 0x20d   :  { %v2202_v52 = vadd.f32 %v2201_v43, %v426_v33  ;;  %v2243_v57 = vadd.f32 %v2242_v44, %v2200_v45  ;;  %v2575_v40 = vshrl.u32 %v2563_v29, 15  ;;  %v4134_v43 = vld [vmem:[#allocation11 + $0x38] sm:$0xff]   ;;  %v4135_v44 = vld [vmem:[#allocation11 + $0x70] sm:$0xff]   ;;  %v2642_v46 = vcvt.s32.f32 %v2630_v38 }
 0x20e   :  { %v2244_v54 = vpop.f32.mrf.mxu1  ;;  %v2581_v45 = vxor.u32 %v2569_v39, %v2557_v27 }
 0x20f   :  { %v2245_v4 = vadd.f32 %v2244_v54, %v2202_v52  ;;  %v2587_v47 = vxor.u32 %v2575_v40, %v2563_v29  ;;  %v4559_v52 = vstv %s2456_s16  ;;  %v4136_v54 = vld [vmem:[#allocation11 + $0x30] sm:$0xff]   ;;  %v2501_v40 = vadd.s32 256, %v4477_v23 }
 0x211   :  { %v2599_v58 = vmul.u32 2221713035, %v2587_v47  ;;  %v2509_v47 = vadd.s32 %v4520_v9, %v2501_v40 }
 0x213   :  { %v2611_v15 = vshrl.u32 %v2599_v58, 16 }
 0x246   :  { %v2281_v48 = vpop.f32.mrf.mxu0 }
 0x247   :  { %v2282_v7 = vadd.f32 %v2281_v48, %v2239_v60  ;;  %v2648_v48 = vcvt.s32.f32 %v2636_v42  ;;  %v4146_v42 = vld [vmem:[#allocation11 + $0x8] sm:$0xff]  }
 0x248   :  { %v2283_v55 = vpop.f32.mrf.mxu0 }
 0x249   :  { %v2284_v53 = vadd.f32 %v2283_v55, %v2241_v50  ;;  %v4555_v50 = vstv %s3540_s1  ;;  %v2660_v60 = vmul.f32 1.1920929e-07, %v2648_v48  ;;  %v2515_v48 = vadd.s32 %v4525_v11, %v2501_v40 }
 0x24a   :  { %v2285_v61 = vpop.f32.mrf.mxu0 }
 0x24b   :  { %v2286_v5 = vadd.f32 %v2285_v61, %v2243_v57  ;;  %4197 = vtanh.f32 %v2284_v53  ;;  %v2654_v57 = vmul.f32 1.1920929e-07, %v2642_v46  ;;  %v2593_v53 = vmul.u32 2221713035, %v2581_v45 }
 0x24c   :  { %v2287_v8 = vpop.f32.mrf.mxu0  ;;  %v2459_v61 = vmul.f32 %v4487_v28, %v4559_v52  ;;  %vm2672_vm4 = vcmp.ge.f32.partialorder %v2660_v60, 0.1 }
 0x24d   :  { %v2288_v13 = vadd.f32 %v2287_v8, %v2245_v4  ;;  %4199 = vtanh.f32 %v2286_v5  ;;  %v2465_v5 = vmul.f32 %v4483_v24, %v4559_v52  ;;  %v4138_v8 = vld [vmem:[#allocation11 + $0x28] sm:$0xff]   ;;  %vm2666_vm3 = vcmp.ge.f32.partialorder %v2654_v57, 0.1 }
 0x24e   :  { %v2605_v28 = vshrl.u32 %v2593_v53, 16  ;;  %vm3590_vm5 = vmpackc.low %vm2672_vm4, %vm2666_vm3  ;;  %v2523_v57 = vadd.s32 %v4528_v16, %v2509_v47 }
 0x24f   :  { %4201 = vtanh.f32 %v2288_v13  ;;  %v2466_v13 = vmul.f32 %v4485_v25, %v4559_v52  ;;  %v2623_v25 = vxor.u32 %v2611_v15, %v2599_v58 }
 0x250   :  { %4203 = vtanh.f32 %v2282_v7  ;;  %v2617_v22 = vxor.u32 %v2605_v28, %v2593_v53  ;;  %v2529_v53 = vadd.s32 %v4528_v16, %v2515_v48  ;;  %v4154_v28 = vld [vmem:[#allocation11 + $0xa8] sm:$0xff]   ;;  %v4164_v48 = vld [vmem:[#allocation11 + $0x80] sm:$0xff]  }
 0x251   :  { %v2635_v29 = vand.u32 8388607, %v2623_v25 }
 0x252   :  { %v2629_v27 = vand.u32 8388607, %v2617_v22 }
 0x253   :  { %v2647_v39 = vcvt.s32.f32 %v2635_v29 }
 0x254   :  { %v2641_v38 = vcvt.s32.f32 %v2629_v27 }
 0x255   :  { %v2659_v45 = vmul.f32 1.1920929e-07, %v2647_v39 }
 0x256   :  { %v2653_v46 = vmul.f32 1.1920929e-07, %v2641_v38  ;;  %v4161_v38 = vld [vmem:[#allocation11 + $0xc8] sm:$0xff]  }
 0x257   :  { %vm2671_vm7 = vcmp.ge.f32.partialorder %v2659_v45, 0.1 }
 0x258   :  { %v4543_v30 = vpop.eup %4197  ;;  %vm2665_vm6 = vcmp.ge.f32.partialorder %v2653_v46, 0.1 }
 0x259   :  { %vm3593_vm8 = vmpackc.low %vm2671_vm7, %vm2665_vm6 }
 0x25a   :  { %v4545_v32 = vpop.eup %4199 }
 0x25c   :  { %v4547_v33 = vpop.eup %4201 }
 0x25d   :  { %v4549_v34 = vpop.eup %4203  ;;  %v2322_v36 = vpack.c.bf16 %v4547_v33, %v4543_v30 }
 0x25e   :  { %v2321_v41 = vpack.c.bf16 %v4545_v32, %v4549_v34 }
 0x25f   :  { %2427 = vmatprep.subr.bf16.mxu1 %v2322_v36  ;;  %v4144_v36 = vld [vmem:[#allocation11 + $0x10] sm:$0xff]  }
 0x260   :  { %2428 = vmatpush1.bf16.msra.mxu1 %v2321_v41  ;;  %v2510_v41 = vadd.s32 %v4520_v9, %v2502_v31 }
 0x261   :  { %3610 = vmatprep.subr.bf16.mxu1 %v4133_v37  ;;  %v4145_v37 = vld [vmem:[#allocation11 + $0x48] sm:$0xff]  }
 0x263   :  { %v2361_v49 = vpop.f32.mrf.mxu1  ;;  %3539 = vmatmul.mubr.msk.bf16.vlgmr.msra.gmra.mxu1 %vm2323_vm2, %v4493_v10  ;;  %v2460_v10 = vmul.f32 %v4481_v3, %v4559_v52 }
 0x264   :  { %3611 = vmatpush3.bf16.msra.mxu1 %v4134_v43  ;;  %v2472_v59 = vmul.f32 %v4555_v50, %v2361_v49  ;;  %v2516_v43 = vadd.s32 %v4525_v11, %v2502_v31  ;;  %v2524_v49 = vadd.s32 %v4528_v16, %v2510_v41 }
 0x265   :  { %v2363_v55 = vpop.f32.mrf.mxu1  ;;  %3612 = vmatprep.subr.bf16.mxu1 %v4135_v44  ;;  %v4147_v44 = vld [vmem:[#allocation11 + $0x40] sm:$0xff]  }
 0x266   :  { %v2473_v4 = vmul.f32 %v4555_v50, %v2363_v55  ;;  %v2484_v35 = vadd.f32 %v2472_v59, %v2459_v61  ;;  %v2530_v55 = vadd.s32 %v4528_v16, %v2516_v43  ;;  %v2536_v58 = vshrl.u32 %v2524_v49, 16  ;;  %v4150_v59 = vld [vmem:[#allocation11 + $0xb8] sm:$0xff]   ;;  %v4151_v61 = vld [vmem:[#allocation11 + $0xf0] sm:$0xff]  }
 0x267   :  { %v2365_v62 = vpop.f32.mrf.mxu1 }
 0x268   :  { %v2478_v7 = vmul.f32 %v4555_v50, %v2365_v62  ;;  %3613 = vmatpush3.bf16.msra.mxu1 %v4136_v54  ;;  %v2485_v18 = vadd.f32 %v2473_v4, %v2460_v10  ;;  %v4148_v54 = vld [vmem:[#allocation11] sm:$0xff]   ;;  %v2542_v60 = vshrl.u32 %v2530_v55, 16  ;;  %v2535_v62 = vshrl.u32 %v2523_v57, 16 }
 0x269   :  { %v2367_v12 = vpop.f32.mrf.mxu1  ;;  %3614 = vmatprep.subr.bf16.mxu1 %v4137_v56  ;;  %v4149_v56 = vld [vmem:[#allocation11 + $0xf8] sm:$0xff]   ;;  %v2541_v10 = vshrl.u32 %v2529_v53, 16  ;;  %v2548_v4 = vxor.u32 %v2536_v58, %v2524_v49 }
 0x26a   :  { %v2490_v3 = vadd.f32 %v2478_v7, %v2465_v5  ;;  %v2479_v17 = vmul.f32 %v4555_v50, %v2367_v12  ;;  %v4152_v5 = vld [vmem:[#allocation11 + $0xb0] sm:$0xff]   ;;  %v2554_v7 = vxor.u32 %v2542_v60, %v2530_v55  ;;  %v2547_v12 = vxor.u32 %v2535_v62, %v2523_v57 }
 0x26b   :  { %v4175_v60 = vld [vmem:[#allocation11 + $0x150] sm:$0xff]  }
 0x26c   :  { %v3594_v24 = vpack.c.bf16 %v2490_v3, %v2484_v35  ;;  %v2491_v19 = vadd.f32 %v2479_v17, %v2466_v13  ;;  %3615 = vmatpush3.bf16.msra.mxu1 %v4138_v8  ;;  %v4153_v8 = vld [vmem:[#allocation11 + $0xe8] sm:$0xff]   ;;  %v2553_v13 = vxor.u32 %v2541_v10, %v2529_v53  ;;  %v2566_v15 = vmul.u32 2146121005, %v2554_v7  ;;  %v4155_v35 = vld [vmem:[#allocation11 + $0xe0] sm:$0xff]   ;;  %v4176_v62 = vld [vmem:[#allocation11 + $0x110] sm:$0xff]   ;;  %3664 = vmatprep.subr.bf16.mxu0 %v4175_v60 }
 0x26d   :  { %3616 = vmatprep.subr.bf16.mxu1 %v4139_v14  ;;  %v2560_v14 = vmul.u32 2146121005, %v2548_v4  ;;  %v2559_v3 = vmul.u32 2146121005, %v2547_v12  ;;  %3665 = vmatpush3.bf16.msra.mxu0 %v4176_v62  ;;  %v4177_v12 = vld [vmem:[#allocation11 + $0x148] sm:$0xff]  }
 0x26e   :  { %v3591_v51 = vpack.c.bf16 %v2491_v19, %v2485_v18  ;;  %v2565_v17 = vmul.u32 2146121005, %v2553_v13  ;;  %v4156_v19 = vld [vmem:[#allocation11 + $0xa0] sm:$0xff]   ;;  %3666 = vmatprep.subr.bf16.mxu0 %v4177_v12 }
 0x26f   :  { %v2572_v18 = vshrl.u32 %v2560_v14, 15 }
 0x270   :  { %3617 = vmatpush3.bf16.msra.mxu1 %v4140_v20  ;;  %3592 = vmatprep.mubr.msk.bf16.mxu1 %vm3590_vm5, %v3591_v51  ;;  %v4157_v20 = vld [vmem:[#allocation11 + $0xd8] sm:$0xff]   ;;  %v2577_v22 = vshrl.u32 %v2565_v17, 15 }
 0x271   :  { %3618 = vmatprep.subr.bf16.mxu1 %v4141_v21  ;;  %v2571_v21 = vshrl.u32 %v2559_v3, 15  ;;  %v2584_v25 = vxor.u32 %v2572_v18, %v2560_v14  ;;  %v4158_v51 = vld [vmem:[#allocation11 + $0x98] sm:$0xff]  }
 0x272   :  { %v2589_v29 = vxor.u32 %v2577_v22, %v2565_v17  ;;  %v2461_v17 = vmul.f32 %v4508_v2, %v4559_v52  ;;  %v2468_v22 = vmul.f32 %v4506_v1, %v4559_v52  ;;  %v2504_v1 = vadd.s32 640, %v4477_v23 }
 0x273   :  { %v2583_v27 = vxor.u32 %v2571_v21, %v2559_v3  ;;  %v2596_v31 = vmul.u32 2221713035, %v2584_v25  ;;  %v4179_v25 = vld [vmem:[#allocation11 + $0x140] sm:$0xff]  }
 0x274   :  { %3619 = vmatpush3.bf16.msra.mxu1 %v4142_v26  ;;  %v2601_v40 = vmul.u32 2221713035, %v2589_v29 }
 0x275   :  { %3620 = vmatprep.subr.bf16.mxu1 %v4143_v6  ;;  %v4159_v6 = vld [vmem:[#allocation11 + $0xd0] sm:$0xff]   ;;  %v2595_v39 = vmul.u32 2221713035, %v2583_v27  ;;  %v2608_v41 = vshrl.u32 %v2596_v31, 16 }
 0x276   :  { %v2613_v45 = vshrl.u32 %v2601_v40, 16 }
 0x277   :  { %v2607_v46 = vshrl.u32 %v2595_v39, 16  ;;  %v2620_v47 = vxor.u32 %v2608_v41, %v2596_v31  ;;  %v2503_v31 = vadd.s32 512, %v4477_v23 }
 0x278   :  { %3621 = vmatpush3.bf16.msra.mxu1 %v4144_v36  ;;  %v4160_v36 = vld [vmem:[#allocation11 + $0x90] sm:$0xff]   ;;  %v2625_v55 = vxor.u32 %v2613_v45, %v2601_v40 }
 0x279   :  { %3622 = vmatprep.subr.bf16.mxu1 %v4145_v37 }
 0x27a   :  { %v2637_v58 = vand.u32 8388607, %v2625_v55 }
 0x27c   :  { %3623 = vmatpush3.bf16.msra.mxu1 %v4146_v42  ;;  %v4162_v42 = vld [vmem:[#allocation11 + $0x88] sm:$0xff]  }
 0x27d   :  { %3624 = vmatprep.subr.bf16.mxu1 %v4147_v44  ;;  %v4163_v44 = vld [vmem:[#allocation11 + $0xc0] sm:$0xff]  }
 0x280   :  { %3625 = vmatpush3.bf16.msra.mxu1 %v4148_v54  ;;  %v2619_v54 = vxor.u32 %v2607_v46, %v2595_v39  ;;  %v2517_v39 = vadd.s32 %v4525_v11, %v2503_v31 }
 0x281   :  { %3632 = vmatprep.subr.bf16.mxu1 %v4149_v56  ;;  %v2632_v56 = vand.u32 8388607, %v2620_v47 }
 0x282   :  { %v2631_v53 = vand.u32 8388607, %v2619_v54 }
 0x283   :  { %3595 = vmatmul.mubr.msk.bf16.vlgmr.msra.gmra.mxu1 %vm3593_vm8, %v3594_v24  ;;  %v2578_v24 = vshrl.u32 %v2566_v15, 15 }
 0x284   :  { %3633 = vmatpush3.bf16.msra.mxu1 %v4150_v59  ;;  %v2644_v59 = vcvt.s32.f32 %v2632_v56  ;;  %v2643_v4 = vcvt.s32.f32 %v2631_v53 }
 0x285   :  { %3634 = vmatprep.subr.bf16.mxu1 %v4151_v61  ;;  %v2590_v26 = vxor.u32 %v2578_v24, %v2566_v15 }
 0x287   :  { %v2602_v37 = vmul.u32 2221713035, %v2590_v26 }
 0x288   :  { %3635 = vmatpush3.bf16.msra.mxu1 %v4152_v5  ;;  %v2649_v5 = vcvt.s32.f32 %v2637_v58 }
 0x289   :  { %3636 = vmatprep.subr.bf16.mxu1 %v4153_v8  ;;  %v2614_v43 = vshrl.u32 %v2602_v37, 16  ;;  %v2656_v8 = vmul.f32 1.1920929e-07, %v2644_v59 }
 0x28a   :  { %v2661_v3 = vmul.f32 1.1920929e-07, %v2649_v5 }
 0x28b   :  { %v2626_v49 = vxor.u32 %v2614_v43, %v2602_v37  ;;  %vm2668_vm9 = vcmp.ge.f32.partialorder %v2656_v8, 0.1  ;;  %v2518_v37 = vadd.s32 %v4525_v11, %v2504_v1  ;;  %v2531_v43 = vadd.s32 %v4528_v16, %v2517_v39 }
 0x28c   :  { %3637 = vmatpush3.bf16.msra.mxu1 %v4154_v28  ;;  %v4178_v28 = vld [vmem:[#allocation11 + $0x108] sm:$0xff]   ;;  %vm2673_vm12 = vcmp.ge.f32.partialorder %v2661_v3, 0.1 }
 0x28d   :  { %3638 = vmatprep.subr.bf16.mxu1 %v4155_v35  ;;  %v2638_v57 = vand.u32 8388607, %v2626_v49  ;;  %v2655_v35 = vmul.f32 1.1920929e-07, %v2643_v4  ;;  %3667 = vmatpush3.bf16.msra.mxu0 %v4178_v28  ;;  %v2532_v41 = vadd.s32 %v4528_v16, %v2518_v37  ;;  %v2543_v23 = vshrl.u32 %v2531_v43, 16 }
 0x28e   :  { %3668 = vmatprep.subr.bf16.mxu0 %v4179_v25 }
 0x28f   :  { %v2650_v61 = vcvt.s32.f32 %v2638_v57  ;;  %vm2667_vm11 = vcmp.ge.f32.partialorder %v2655_v35, 0.1  ;;  %v2544_v46 = vshrl.u32 %v2532_v41, 16  ;;  %v2555_v54 = vxor.u32 %v2543_v23, %v2531_v43 }
 0x290   :  { %3639 = vmatpush3.bf16.msra.mxu1 %v4156_v19  ;;  %v2467_v19 = vmul.f32 %v4504_v0, %v4559_v52  ;;  %vm3599_vm14 = vmpackc.low %vm2673_vm12, %vm2667_vm11 }
 0x291   :  { %3640 = vmatprep.subr.bf16.mxu1 %v4157_v20  ;;  %v2662_v14 = vmul.f32 1.1920929e-07, %v2650_v61  ;;  %v2462_v20 = vmul.f32 %v4502_v63, %v4559_v52  ;;  %v2567_v11 = vmul.u32 2146121005, %v2555_v54 }
 0x293   :  { %vm2674_vm10 = vcmp.ge.f32.partialorder %v2662_v14, 0.1  ;;  %v2579_v59 = vshrl.u32 %v2567_v11, 15 }
 0x294   :  { %3641 = vmatpush3.bf16.msra.mxu1 %v4158_v51  ;;  %vm3596_vm13 = vmpackc.low %vm2674_vm10, %vm2668_vm9 }
 0x295   :  { %3642 = vmatprep.subr.bf16.mxu1 %v4159_v6  ;;  %v4180_v6 = vld [vmem:[#allocation11 + $0x100] sm:$0xff]  }
 0x296   :  { %3669 = vmatpush3.bf16.msra.mxu0 %v4180_v6 }
 0x298   :  { %3643 = vmatpush3.bf16.msra.mxu1 %v4160_v36  ;;  %v2512_v36 = vadd.s32 %v4520_v9, %v2504_v1  ;;  %v2463_v1 = vmul.f32 %v4549_v34, %v4559_v52 }
 0x299   :  { %3644 = vmatprep.subr.bf16.mxu1 %v4161_v38  ;;  %v2511_v38 = vadd.s32 %v4520_v9, %v2503_v31 }
 0x29a   :  { %v2526_v40 = vadd.s32 %v4528_v16, %v2512_v36  ;;  %v2469_v36 = vmul.f32 %v4545_v32, %v4559_v52 }
 0x29c   :  { %3645 = vmatpush3.bf16.msra.mxu1 %v4162_v42  ;;  %v2525_v42 = vadd.s32 %v4528_v16, %v2511_v38  ;;  %v2591_v16 = vxor.u32 %v2579_v59, %v2567_v11  ;;  %v2464_v38 = vmul.f32 %v4543_v30, %v4559_v52 }
 0x29d   :  { %3646 = vmatprep.subr.bf16.mxu1 %v4163_v44  ;;  %v2538_v44 = vshrl.u32 %v2526_v40, 16 }
 0x29e   :  { %v2537_v45 = vshrl.u32 %v2525_v42, 16 }
 0x29f   :  { %v2550_v47 = vxor.u32 %v2538_v44, %v2526_v40  ;;  %v2470_v40 = vmul.f32 %v4547_v33, %v4559_v52 }
 0x2a0   :  { %3647 = vmatpush3.bf16.msra.mxu1 %v4164_v48  ;;  %v2556_v48 = vxor.u32 %v2544_v46, %v2532_v41  ;;  %v2549_v49 = vxor.u32 %v2537_v45, %v2525_v42 }
 0x2a1   :  { %v2562_v55 = vmul.u32 2146121005, %v2550_v47 }
 0x2a2   :  { %v2568_v9 = vmul.u32 2146121005, %v2556_v48  ;;  %v2561_v56 = vmul.u32 2146121005, %v2549_v49 }
 0x2a3   :  { %v2574_v57 = vshrl.u32 %v2562_v55, 15 }
 0x2a4   :  { %v2580_v53 = vshrl.u32 %v2568_v9, 15  ;;  %v2573_v58 = vshrl.u32 %v2561_v56, 15 }
 0x2a5   :  { %v2404_v10 = vpop.f32.mrf.mxu1  ;;  %v2586_v60 = vxor.u32 %v2574_v57, %v2562_v55 }
 0x2a6   :  { %v2474_v13 = vmul.f32 %v4555_v50, %v2404_v10  ;;  %v2592_v61 = vxor.u32 %v2580_v53, %v2568_v9  ;;  %v2585_v62 = vxor.u32 %v2573_v58, %v2561_v56 }
 0x2a7   :  { %v2406_v7 = vpop.f32.mrf.mxu1  ;;  %v2598_v10 = vmul.u32 2221713035, %v2586_v60 }
 0x2a8   :  { %v2475_v18 = vmul.f32 %v4555_v50, %v2406_v7  ;;  %v2486_v51 = vadd.f32 %v2474_v13, %v2461_v17  ;;  %v2604_v4 = vmul.u32 2221713035, %v2592_v61  ;;  %v2597_v5 = vmul.u32 2221713035, %v2585_v62 }
 0x2a9   :  { %v2408_v15 = vpop.f32.mrf.mxu1  ;;  %v2603_v7 = vmul.u32 2221713035, %v2591_v16  ;;  %v2610_v8 = vshrl.u32 %v2598_v10, 16 }
 0x2aa   :  { %v2480_v24 = vmul.f32 %v4555_v50, %v2408_v15  ;;  %v2487_v0 = vadd.f32 %v2475_v18, %v2462_v20  ;;  %v2616_v12 = vshrl.u32 %v2604_v4, 16  ;;  %v2609_v13 = vshrl.u32 %v2597_v5, 16 }
 0x2ab   :  { %v2410_v21 = vpop.f32.mrf.mxu1  ;;  %v2615_v14 = vshrl.u32 %v2603_v7, 16  ;;  %v2622_v28 = vxor.u32 %v2610_v8, %v2598_v10 }
 0x2ac   :  { %v2492_v26 = vadd.f32 %v2480_v24, %v2467_v19  ;;  %v2481_v2 = vmul.f32 %v4555_v50, %v2410_v21  ;;  %v2628_v15 = vxor.u32 %v2616_v12, %v2604_v4  ;;  %v2621_v35 = vxor.u32 %v2609_v13, %v2597_v5 }
 0x2ad   :  { %v2627_v3 = vxor.u32 %v2615_v14, %v2603_v7  ;;  %v2634_v17 = vand.u32 8388607, %v2622_v28 }
 0x2ae   :  { %v3600_v27 = vpack.c.bf16 %v2492_v26, %v2486_v51  ;;  %v2493_v29 = vadd.f32 %v2481_v2, %v2468_v22  ;;  %v2640_v18 = vand.u32 8388607, %v2628_v15  ;;  %v2633_v19 = vand.u32 8388607, %v2621_v35 }
 0x2af   :  { %v2639_v24 = vand.u32 8388607, %v2627_v3  ;;  %v2646_v20 = vcvt.s32.f32 %v2634_v17 }
 0x2b0   :  { %v3597_v63 = vpack.c.bf16 %v2493_v29, %v2487_v0  ;;  %v2652_v21 = vcvt.s32.f32 %v2640_v18  ;;  %v2645_v25 = vcvt.s32.f32 %v2633_v19 }
 0x2b1   :  { %v2651_v51 = vcvt.s32.f32 %v2639_v24  ;;  %v2658_v2 = vmul.f32 1.1920929e-07, %v2646_v20 }
 0x2b2   :  { %3598 = vmatprep.mubr.msk.bf16.mxu1 %vm3596_vm13, %v3597_v63  ;;  %v2664_v0 = vmul.f32 1.1920929e-07, %v2652_v21  ;;  %v2657_v29 = vmul.f32 1.1920929e-07, %v2645_v25 }
 0x2b3   :  { %3601 = vmatmul.mubr.msk.bf16.vlgmr.msra.gmra.mxu1 %vm3599_vm14, %v3600_v27  ;;  %v2663_v63 = vmul.f32 1.1920929e-07, %v2651_v51  ;;  %vm2670_vm15 = vcmp.ge.f32.partialorder %v2658_v2, 0.1 }
 0x2b4   :  { %vm2676_vm0 = vcmp.ge.f32.partialorder %v2664_v0, 0.1  ;;  %vm2669_vm1 = vcmp.ge.f32.partialorder %v2657_v29, 0.1 }
 0x2b5   :  { %vm2675_vm2 = vcmp.ge.f32.partialorder %v2663_v63, 0.1  ;;  %vm3602_vm3 = vmpackc.low %vm2676_vm0, %vm2670_vm15 }
 0x2b6   :  { %vm3605_vm4 = vmpackc.low %vm2675_vm2, %vm2669_vm1 }
 0x323   :  { %v2447_v22 = vpop.f32.mrf.mxu1 }
 0x324   :  { %v2476_v6 = vmul.f32 %v4555_v50, %v2447_v22 }
 0x325   :  { %v2449_v26 = vpop.f32.mrf.mxu1 }
 0x326   :  { %v2477_v31 = vmul.f32 %v4555_v50, %v2449_v26  ;;  %v2488_v41 = vadd.f32 %v2476_v6, %v2463_v1 }
 0x327   :  { %v2451_v27 = vpop.f32.mrf.mxu1 }
 0x328   :  { %v2482_v37 = vmul.f32 %v4555_v50, %v2451_v27  ;;  %v2489_v34 = vadd.f32 %v2477_v31, %v2464_v38 }
 0x329   :  { %v2453_v39 = vpop.f32.mrf.mxu1 }
 0x32a   :  { %v2494_v42 = vadd.f32 %v2482_v37, %v2469_v36  ;;  %v2483_v43 = vmul.f32 %v4555_v50, %v2453_v39  ;;  %v3541_v50 = vld [vmem:[#allocation13] ss:$0 sm:$0xff] }
 0x32c   :  { %v3606_v44 = vpack.c.bf16 %v2494_v42, %v2488_v41  ;;  %v2495_v32 = vadd.f32 %v2483_v43, %v2470_v40 }
 0x32e   :  { %v3603_v46 = vpack.c.bf16 %v2495_v32, %v2489_v34 }
 0x330   :  { %3604 = vmatprep.mubr.msk.bf16.mxu0 %vm3602_vm3, %v3603_v46 }
 0x331   :  { %3607 = vmatmul.mubr.msk.bf16.vlgmr.msra.gmra.mxu0 %vm3605_vm4, %v3606_v44 }
 0x343   :  { %v3626_v30 = vpop.f32.mrf.mxu1 }
 0x345   :  { %v3627_v45 = vpop.f32.mrf.mxu1 }
 0x346   :  { %v3628_v49 = vadd.f32 %v3627_v45, %v3626_v30 }
 0x347   :  { %v3629_v23 = vpop.f32.mrf.mxu1 }
 0x348   :  { %v3121_v56 = vadd.f32 %v3628_v49, %v3541_v50 }
 0x349   :  { %v3630_v33 = vpop.f32.mrf.mxu1 }
 0x34a   :  { %v3631_v11 = vadd.f32 %v3630_v33, %v3629_v23 }
 0x34c   :  { %v3124_v61 = vadd.f32 %v3631_v11, %v3541_v50 }
 0x373   :  { %v3648_v52 = vpop.f32.mrf.mxu1 }
 0x375   :  { %v3649_v47 = vpop.f32.mrf.mxu1 }
 0x376   :  { %v3650_v54 = vadd.f32 %v3649_v47, %v3648_v52 }
 0x377   :  { %v3651_v48 = vpop.f32.mrf.mxu1 }
 0x378   :  { %v3162_v53 = vadd.f32 %v3650_v54, %v3121_v56 }
 0x379   :  { %v3652_v55 = vpop.f32.mrf.mxu1 }
 0x37a   :  { %v3653_v58 = vadd.f32 %v3652_v55, %v3651_v48 }
 0x37c   :  { %v3165_v10 = vadd.f32 %v3653_v58, %v3124_v61 }
 0x3f1   :  { %v3670_v9 = vpop.f32.mrf.mxu0 }
 0x3f3   :  { %v3671_v57 = vpop.f32.mrf.mxu0 }
 0x3f4   :  { %v3672_v59 = vadd.f32 %v3671_v57, %v3670_v9 }
 0x3f5   :  { %v3673_v60 = vpop.f32.mrf.mxu0 }
 0x3f6   :  { %v3203_v62 = vadd.f32 %v3672_v59, %v3162_v53 }
 0x3f7   :  { %v3674_v16 = vpop.f32.mrf.mxu0 }
 0x3f8   :  { %v3608_v4 = vmul.f32 -1.442695, %v3203_v62  ;;  %v3675_v5 = vadd.f32 %v3674_v16, %v3673_v60 }
 0x3fa   :  { %4205 = vpow2.f32 %v3608_v4  ;;  %v3206_v7 = vadd.f32 %v3675_v5, %v3165_v10 }
 0x3fc   :  { %v3609_v8 = vmul.f32 -1.442695, %v3206_v7 }
 0x3fe   :  { %4207 = vpow2.f32 %v3609_v8 }
 0x407   :  { %v4206_v12 = vpop.eup %4205 }
 0x408   :  { %v3215_v13 = vadd.f32 1.0, %v4206_v12 }
 0x40a   :  { %4209 = vrcp.f32 %v3215_v13 }
 0x40b   :  { %v4208_v14 = vpop.eup %4207 }
 0x40c   :  { %v3216_v28 = vadd.f32 1.0, %v4208_v14 }
 0x40e   :  { %4211 = vrcp.f32 %v3216_v28 }
 0x417   :  { %v4210_v15 = vpop.eup %4209 }
 0x418   :  { %3221 = vst [vmem:[#allocation14] sm:$0xff] %v4210_v15 }
 0x41b   :  { %v4212_v35 = vpop.eup %4211 }
 0x41c   :  { %3222 = vst [vmem:[#allocation14 + $0x8] sm:$0xff] %v4212_v35 }
 0x41d   :  { %4338 = shalt.err (!%p4335_p1)
}
 0x41e   :  { %s4370_s20 = smov 128   ;;  %s4371_s21 = smov 8  }
 0x41f   :  { %3234 = dma.vmem_to_hbm [thread:$0]  %s3229_s18, 256, %s4628_s8, [#allocation5], %s4370_s20, %s4370_s20, %s4371_s21  }
 0x420   :  { %4355 = dma.done.wait [#allocation5], 256  }
 0x421   :  { %4356 = vsyncadd [#allocation5], 4294967040 }
 0x422   :  { %3238 = vsyncpa [#allocation4], 1 }
 0x423   :  { %3239 = vsyncpa [#allocation9], 1 }
 0x424   :  { %3240 = vsyncpa [#allocation12], 1 }
 0x425   :  { %3241 = vsyncpa [#allocation5], 1 }
 0x426   :  { %3242 = vsyncpa [#allocation6], 1 }

</bundles_post_ra>
